<compile_context>
chip_gen: v5e
topology: v5e:2x2
jax: 0.10.0
libtpu: 0.0.40
codegen_flags: <defaults>
</compile_context>

<pallas_src>
import functools

import jax
import jax.numpy as jnp
from jax.experimental import pallas as pl
from jax.experimental.pallas import tpu as pltpu


def _gelu_tanh(v):
    # tanh-approximate GELU (runs on the EUP tanh unit).
    # TODO(synk): PyTorch F.gelu defaults to the exact erf form; the tanh
    # approximation differs by < 1e-3 absolute.
    c = 0.7978845608028654  # sqrt(2/pi)
    return 0.5 * v * (1.0 + jnp.tanh(c * (v + 0.044715 * v * v * v)))


def _layer_norm_channels(v, gamma, beta, eps, inv_c):
    # v: (C, T); normalize over the channel (sublane) axis per time step.
    # One-pass moments: var = E[v^2] - mean^2 (eps keeps rsqrt safe).
    s1 = jnp.sum(v, axis=0, keepdims=True)
    s2 = jnp.sum(v * v, axis=0, keepdims=True)
    mean = s1 * inv_c
    var = s2 * inv_c - mean * mean
    return (v - mean) * jax.lax.rsqrt(var + eps) * gamma + beta


def _dds_conv_kernel(x_ref, m_ref, wsep_ref, bsep_ref, w11_ref, b11_ref,
                     g1_ref, be1_ref, g2_ref, be2_ref, o_ref,
                     xres_ref, xmpad_ref,
                     *, n_layers, kernel_size, eps, pad_left):
    C, T = x_ref.shape[1], x_ref.shape[2]
    inv_c = jnp.float32(1.0 / C)
    mask = m_ref[0].astype(jnp.float32)                 # (1, T)

    # Residual carried in a dedicated f32 VMEM scratch (bounds vreg live ranges
    # across the fully-unrolled layer loop).
    xres_ref[...] = x_ref[0].astype(jnp.float32)        # (C, T)

    # Zero the halo columns of the padded depthwise-input scratch.  Done every
    # grid step (cheap) so each megacore's private scratch is always valid.
    if pad_left > 0:
        zero_pad = jnp.zeros((C, pad_left), jnp.float32)
        xmpad_ref[:, :pad_left] = zero_pad
        xmpad_ref[:, pad_left + T:] = zero_pad

    half = (kernel_size - 1) // 2
    for i in range(n_layers):                            # static unroll
        dilation = kernel_size ** i

        # Masked input staged into the zero-padded scratch: every tap below is a
        # plain static-offset load (no roll / iota / where on the VPU path).
        xmpad_ref[:, pad_left:pad_left + T] = xres_ref[...] * mask

        # Hoist per-tap weight columns (and casts) out of the tap loop.
        w_sep = wsep_ref[i].astype(jnp.float32)          # (C, K)
        w_cols = [w_sep[:, j:j + 1] for j in range(kernel_size)]

        # Depthwise dilated conv ('same' padding) as K shifted multiply-adds.
        y = w_cols[half] * xmpad_ref[:, pad_left:pad_left + T]
        for j in range(kernel_size):
            if j == half:
                continue
            off = (j - half) * dilation
            y = y + w_cols[j] * xmpad_ref[:, pad_left + off:pad_left + off + T]
        y = y + bsep_ref[i].astype(jnp.float32)          # (C, 1) bias

        y = _layer_norm_channels(y, g1_ref[i].astype(jnp.float32),
                                 be1_ref[i].astype(jnp.float32), eps, inv_c)
        y = _gelu_tanh(y)

        # 1x1 conv == (C, C) x (C, T) matmul on the MXU.  bf16 operands (f32 MXU
        # input is emulated on every TPU generation), f32 accumulation.
        y = jnp.dot(w11_ref[i], y.astype(jnp.bfloat16),
                    preferred_element_type=jnp.float32)
        y = y + b11_ref[i].astype(jnp.float32)

        y = _layer_norm_channels(y, g2_ref[i].astype(jnp.float32),
                                 be2_ref[i].astype(jnp.float32), eps, inv_c)
        y = _gelu_tanh(y)

        # TODO(synk): dropout is identity here (p_dropout=0 / eval mode).
        xres_ref[...] = xres_ref[...] + y

    o_ref[0] = (xres_ref[...] * mask).astype(o_ref.dtype)


def _round_up(n, m):
    return ((n + m - 1) // m) * m


def _vmem_limit_bytes():
    # Generation-aware scoped-VMEM limit: ~85% of physical, capped at 100 MiB
    # (v5e/v6e have 128 MiB per core; v7x has 64 MiB -> ~54 MiB scoped).
    cap = 64 * 1024 * 1024
    try:
        info = pltpu.get_tpu_info()
        cap = int(getattr(info, "vmem_capacity_bytes", cap))
    except Exception:
        pass
    return min(int(cap * 0.85), 100 * 1024 * 1024)


def dds_conv(x, x_mask, params, *, kernel_size, eps=1e-5, g=None):
    """Fused DDSConv forward.

    x: (B, C, T); x_mask: (B, 1, T); params: dict of per-layer weights stacked
    along a leading n_layers dim.
    """
    if g is not None:
        x = x + g          # conditioning add: cheap glue, done in plain JAX

    B, C, T = x.shape
    L, _, K = params["w_sep"].shape
    assert kernel_size == K and kernel_size % 2 == 1, "odd kernel_size required"
    assert x_mask.shape == (B, 1, T)

    # Pad T to a lane-dense multiple of 128 (unmasked vst stores, aligned slabs).
    # The mask is zero-extended so padded columns never leak into the conv.
    Tp = _round_up(T, 128)
    if Tp != T:
        x = jnp.pad(x, ((0, 0), (0, 0), (0, Tp - T)))
        x_mask = jnp.pad(x_mask, ((0, 0), (0, 0), (0, Tp - T)))

    half = (kernel_size - 1) // 2
    max_pad = half * kernel_size ** (L - 1)          # widest single-layer halo
    pad_left = _round_up(max_pad, 128) if max_pad > 0 else 0

    # bf16 MXU operands for the 1x1 conv (also halves the weight HBM/VMEM cost).
    w11 = params["w_1x1"].astype(jnp.bfloat16)

    kernel = functools.partial(_dds_conv_kernel, n_layers=L,
                               kernel_size=kernel_size, eps=float(eps),
                               pad_left=pad_left)

    def const_spec(shape):
        # Constant index_map => fetched once by the pipeline.
        # TODO(synk): single-buffer these (pipeline_mode=pl.Buffered(1)) to drop
        # the redundant second buffer once that path is load-bearing for large C.
        return pl.BlockSpec(shape, lambda b: (0,) * len(shape))

    itemsize = jnp.dtype(x.dtype).itemsize
    weight_bytes = int(w11.size) * 2 + sum(
        int(v.size) * jnp.dtype(v.dtype).itemsize
        for k, v in params.items() if k != "w_1x1")
    cost = pl.CostEstimate(
        flops=int(L * (2 * B * C * C * Tp + 2 * B * C * K * Tp + 14 * B * C * Tp)),
        transcendentals=int(L * 2 * B * C * Tp),
        bytes_accessed=int((2 * B * C * Tp + B * Tp) * itemsize + weight_bytes),
    )

    # TODO(synk): on v7x (2 TensorCores), grid=(B,) only feeds both cores when
    # B >= 2; for B == 1 split T into halo'd halves or split batch upstream.
    out = pl.pallas_call(
        kernel,
        out_shape=jax.ShapeDtypeStruct((B, C, Tp), x.dtype),
        grid=(B,),
        in_specs=[
            pl.BlockSpec((1, C, Tp), lambda b: (b, 0, 0)),   # x: full (C, T) slab
            pl.BlockSpec((1, 1, Tp), lambda b: (b, 0, 0)),   # mask slab
            const_spec((L, C, K)),                           # depthwise weights
            const_spec((L, C, 1)),                           # depthwise bias
            const_spec((L, C, C)),                           # 1x1 weights (bf16)
            const_spec((L, C, 1)),                           # 1x1 bias
            const_spec((L, C, 1)), const_spec((L, C, 1)),    # LN1 gamma / beta
            const_spec((L, C, 1)), const_spec((L, C, 1)),    # LN2 gamma / beta
        ],
        out_specs=pl.BlockSpec((1, C, Tp), lambda b: (b, 0, 0)),
        scratch_shapes=[
            pltpu.VMEM((C, Tp), jnp.float32),                 # f32 residual home
            pltpu.VMEM((C, Tp + 2 * pad_left), jnp.float32),  # zero-padded xm
        ],
        compiler_params=pltpu.CompilerParams(
            dimension_semantics=("parallel",),                # batch over megacore
            vmem_limit_bytes=_vmem_limit_bytes()),
        cost_estimate=cost,
    )(x, x_mask, params["w_sep"], params["b_sep"], w11,
      params["b_1x1"], params["gamma1"], params["beta1"],
      params["gamma2"], params["beta2"])

    if Tp != T:
        out = out[:, :, :T]
    return out


class DDSConv:
    """JAX/Pallas port of the PyTorch DDSConv module (inference forward)."""

    def __init__(self, channels, kernel_size, n_layers, key, p_dropout=0.0):
        assert kernel_size % 2 == 1
        self.channels = channels
        self.kernel_size = kernel_size
        self.n_layers = n_layers
        self.p_dropout = p_dropout    # TODO(synk): training-mode dropout not applied
        C, K, L = channels, kernel_size, n_layers
        ks = jax.random.split(key, 4)
        wscale = 1.0 / (C ** 0.5)
        self.params = {
            "w_sep": wscale * jax.random.normal(ks[0], (L, C, K), jnp.float32),
            "b_sep": 0.1 * jax.random.normal(ks[1], (L, C, 1), jnp.float32),
            "w_1x1": wscale * jax.random.normal(ks[2], (L, C, C), jnp.float32),
            "b_1x1": 0.1 * jax.random.normal(ks[3], (L, C, 1), jnp.float32),
            "gamma1": jnp.ones((L, C, 1), jnp.float32),
            "beta1": jnp.zeros((L, C, 1), jnp.float32),
            "gamma2": jnp.ones((L, C, 1), jnp.float32),
            "beta2": jnp.zeros((L, C, 1), jnp.float32),
        }

    def __call__(self, x, x_mask, g=None):
        return dds_conv(x, x_mask, self.params, kernel_size=self.kernel_size, g=g)


def dds_conv_ref(x, x_mask, params, *, kernel_size, eps=1e-5, g=None,
                 matmul_dtype=None):
    """Plain-JAX reference (matches the PyTorch forward, tanh-GELU variant).

    matmul_dtype=jnp.bfloat16 mirrors the kernel's bf16 MXU operands.
    """
    if g is not None:
        x = x + g
    B, C, T = x.shape
    L, _, K = params["w_sep"].shape

    def ln(v, gamma, beta):
        mean = jnp.mean(v, axis=1, keepdims=True)
        var = jnp.mean((v - mean) ** 2, axis=1, keepdims=True)
        return ((v - mean) / jnp.sqrt(var + eps)) * gamma.reshape(1, C, 1) \
            + beta.reshape(1, C, 1)

    for i in range(L):
        d = kernel_size ** i
        pad = (kernel_size * d - d) // 2
        xm = x * x_mask
        y = jax.lax.conv_general_dilated(
            xm, params["w_sep"][i][:, None, :],
            window_strides=(1,), padding=[(pad, pad)],
            rhs_dilation=(d,), feature_group_count=C,
            dimension_numbers=("NCH", "OIH", "NCH"))
        y = y + params["b_sep"][i].reshape(1, C, 1)
        y = ln(y, params["gamma1"][i], params["beta1"][i])
        y = _gelu_tanh(y)
        w11 = params["w_1x1"][i]
        yin = y
        if matmul_dtype is not None:
            w11 = w11.astype(matmul_dtype)
            yin = y.astype(matmul_dtype)
        y = jnp.einsum("oc,bct->bot", w11, yin,
                       preferred_element_type=jnp.float32) \
            + params["b_1x1"][i].reshape(1, C, 1)
        y = ln(y, params["gamma2"][i], params["beta2"][i])
        y = _gelu_tanh(y)
        x = x + y
    return x * x_mask


if __name__ == "__main__":
    key = jax.random.PRNGKey(0)
    k_layer, k_x, k_g, k_g1, k_b1, k_g2, k_b2 = jax.random.split(key, 7)

    B, C, T = 2, 8, 200               # T deliberately not a multiple of 128
    K, L = 3, 3                       # dilations 1, 3, 9

    layer = DDSConv(C, K, L, k_layer)
    # Perturb the LayerNorm affine params so they are exercised non-trivially.
    layer.params["gamma1"] = 1.0 + 0.1 * jax.random.normal(k_g1, (L, C, 1), jnp.float32)
    layer.params["beta1"] = 0.1 * jax.random.normal(k_b1, (L, C, 1), jnp.float32)
    layer.params["gamma2"] = 1.0 + 0.1 * jax.random.normal(k_g2, (L, C, 1), jnp.float32)
    layer.params["beta2"] = 0.1 * jax.random.normal(k_b2, (L, C, 1), jnp.float32)

    x = jax.random.normal(k_x, (B, C, T), dtype=jnp.float32)
    g = 0.1 * jax.random.normal(k_g, (B, C, T), dtype=jnp.float32)
    lengths = jnp.array([T, 3 * T // 4], dtype=jnp.int32)
    x_mask = (jnp.arange(T)[None, None, :] < lengths[:, None, None]).astype(jnp.float32)

    out = layer(x, x_mask, g=g)
    out = jax.block_until_ready(out)
    assert out.shape == (B, C, T)

    # Tight check vs a reference that mirrors the kernel's bf16 MXU operands.
    ref_bf16 = dds_conv_ref(x, x_mask, layer.params, kernel_size=K, g=g,
                            matmul_dtype=jnp.bfloat16)
    err_b = float(jnp.max(jnp.abs(out - ref_bf16)))
    assert jnp.allclose(out, ref_bf16, atol=5e-3, rtol=5e-3), err_b

    # Looser check vs the pure-f32 reference (bf16 matmul operand rounding).
    ref_f32 = dds_conv_ref(x, x_mask, layer.params, kernel_size=K, g=g)
    err_f = float(jnp.max(jnp.abs(out - ref_f32)))
    assert jnp.allclose(out, ref_f32, atol=5e-2, rtol=5e-2), err_f

    print("KERNEL_OK")
</pallas_src>

<mosaic_0001>
module attributes {stable_mosaic.version = 11 : i64} {
  func.func @_dds_conv_kernel(%arg0: i32, %arg1: memref<1x8x256xf32, #tpu.memory_space<vmem>>, %arg2: memref<1x1x256xf32, #tpu.memory_space<vmem>>, %arg3: memref<3x8x3xf32, #tpu.memory_space<vmem>>, %arg4: memref<3x8x1xf32, #tpu.memory_space<vmem>>, %arg5: memref<3x8x8xbf16, #tpu.memory_space<vmem>>, %arg6: memref<3x8x1xf32, #tpu.memory_space<vmem>>, %arg7: memref<3x8x1xf32, #tpu.memory_space<vmem>>, %arg8: memref<3x8x1xf32, #tpu.memory_space<vmem>>, %arg9: memref<3x8x1xf32, #tpu.memory_space<vmem>>, %arg10: memref<3x8x1xf32, #tpu.memory_space<vmem>>, %arg11: memref<1x8x256xf32, #tpu.memory_space<vmem>>, %arg12: memref<8x256xf32, #tpu.memory_space<vmem>>, %arg13: memref<8x512xf32, #tpu.memory_space<vmem>>) attributes {dimension_semantics = [#tpu.dimension_semantics<parallel>], iteration_bounds = array<i64: 2>, scalar_prefetch = 0 : i64, scratch_operands = 2 : i64, tpu.core_type = #tpu.core_type<tc>, window_params = [{transform_indices = @transform_0, window_bounds = array<i64: 1, 8, 256>}, {transform_indices = @transform_1, window_bounds = array<i64: 1, 1, 256>}, {pipeline_mode = #tpu.pipeline_mode<synchronous>, transform_indices = @transform_2, window_bounds = array<i64: 3, 8, 3>}, {pipeline_mode = #tpu.pipeline_mode<synchronous>, transform_indices = @transform_3, window_bounds = array<i64: 3, 8, 1>}, {pipeline_mode = #tpu.pipeline_mode<synchronous>, transform_indices = @transform_4, window_bounds = array<i64: 3, 8, 8>}, {pipeline_mode = #tpu.pipeline_mode<synchronous>, transform_indices = @transform_5, window_bounds = array<i64: 3, 8, 1>}, {pipeline_mode = #tpu.pipeline_mode<synchronous>, transform_indices = @transform_6, window_bounds = array<i64: 3, 8, 1>}, {pipeline_mode = #tpu.pipeline_mode<synchronous>, transform_indices = @transform_7, window_bounds = array<i64: 3, 8, 1>}, {pipeline_mode = #tpu.pipeline_mode<synchronous>, transform_indices = @transform_8, window_bounds = array<i64: 3, 8, 1>}, {pipeline_mode = #tpu.pipeline_mode<synchronous>, transform_indices = @transform_9, window_bounds = array<i64: 3, 8, 1>}, {transform_indices = @transform_10, window_bounds = array<i64: 1, 8, 256>}]} {
    %c0 = arith.constant 0 : index
    %c0_0 = arith.constant 0 : index
    %c0_1 = arith.constant 0 : index
    %0 = vector.load %arg2[%c0, %c0_0, %c0_1] : memref<1x1x256xf32, #tpu.memory_space<vmem>>, vector<1x1x256xf32>
    %1 = vector.shape_cast %0 : vector<1x1x256xf32> to vector<1x256xf32>
    %c0_2 = arith.constant 0 : index
    %c0_3 = arith.constant 0 : index
    %c0_4 = arith.constant 0 : index
    %2 = vector.load %arg1[%c0_2, %c0_3, %c0_4] : memref<1x8x256xf32, #tpu.memory_space<vmem>>, vector<1x8x256xf32>
    %3 = vector.shape_cast %2 : vector<1x8x256xf32> to vector<8x256xf32>
    %c0_5 = arith.constant 0 : index
    %c0_6 = arith.constant 0 : index
    %4 = vector.load %arg12[%c0_5, %c0_6] : memref<8x256xf32, #tpu.memory_space<vmem>>, vector<8x256xf32>
    tpu.vector_store %arg12[%c0_5, %c0_6], %3 {strides = array<i32>} : memref<8x256xf32, #tpu.memory_space<vmem>>, vector<8x256xf32>,
    %cst = arith.constant 0.000000e+00 : f32
    %5 = vector.broadcast %cst : f32 to vector<8x128xf32>
    %c0_7 = arith.constant 0 : index
    %c0_8 = arith.constant 0 : index
    %6 = vector.load %arg13[%c0_7, %c0_8] : memref<8x512xf32, #tpu.memory_space<vmem>>, vector<8x128xf32>
    tpu.vector_store %arg13[%c0_7, %c0_8], %5 {strides = array<i32>} : memref<8x512xf32, #tpu.memory_space<vmem>>, vector<8x128xf32>,
    %c0_9 = arith.constant 0 : index
    %c384 = arith.constant 384 : index
    %7 = vector.load %arg13[%c0_9, %c384] : memref<8x512xf32, #tpu.memory_space<vmem>>, vector<8x128xf32>
    tpu.vector_store %arg13[%c0_9, %c384], %5 {strides = array<i32>} : memref<8x512xf32, #tpu.memory_space<vmem>>, vector<8x128xf32>,
    %c0_10 = arith.constant 0 : index
    %c0_11 = arith.constant 0 : index
    %8 = vector.load %arg12[%c0_10, %c0_11] : memref<8x256xf32, #tpu.memory_space<vmem>>, vector<8x256xf32>
    %9 = vector.broadcast %1 : vector<1x256xf32> to vector<8x256xf32>
    %10 = arith.mulf %8, %9 : vector<8x256xf32>
    %c0_12 = arith.constant 0 : index
    %c128 = arith.constant 128 : index
    %11 = vector.load %arg13[%c0_12, %c128] : memref<8x512xf32, #tpu.memory_space<vmem>>, vector<8x256xf32>
    tpu.vector_store %arg13[%c0_12, %c128], %10 {strides = array<i32>} : memref<8x512xf32, #tpu.memory_space<vmem>>, vector<8x256xf32>,
    %c0_13 = arith.constant 0 : index
    %c0_14 = arith.constant 0 : index
    %c0_15 = arith.constant 0 : index
    %12 = vector.load %arg3[%c0_13, %c0_14, %c0_15] : memref<3x8x3xf32, #tpu.memory_space<vmem>>, vector<1x8x3xf32>
    %13 = vector.shape_cast %12 : vector<1x8x3xf32> to vector<8x3xf32>
    %14 = vector.extract_strided_slice %13 {offsets = [0, 0], sizes = [8, 1], strides = [1, 1]} : vector<8x3xf32> to vector<8x1xf32>
    %15 = vector.extract_strided_slice %13 {offsets = [0, 1], sizes = [8, 1], strides = [1, 1]} : vector<8x3xf32> to vector<8x1xf32>
    %16 = vector.extract_strided_slice %13 {offsets = [0, 2], sizes = [8, 1], strides = [1, 1]} : vector<8x3xf32> to vector<8x1xf32>
    %c0_16 = arith.constant 0 : index
    %c128_17 = arith.constant 128 : index
    %17 = vector.load %arg13[%c0_16, %c128_17] : memref<8x512xf32, #tpu.memory_space<vmem>>, vector<8x256xf32>
    %18 = vector.broadcast %15 : vector<8x1xf32> to vector<8x256xf32>
    %19 = arith.mulf %18, %17 : vector<8x256xf32>
    %c0_18 = arith.constant 0 : index
    %c127 = arith.constant 127 : index
    %20 = vector.load %arg13[%c0_18, %c127] : memref<8x512xf32, #tpu.memory_space<vmem>>, vector<8x256xf32>
    %21 = vector.broadcast %14 : vector<8x1xf32> to vector<8x256xf32>
    %22 = arith.mulf %21, %20 : vector<8x256xf32>
    %23 = arith.addf %19, %22 : vector<8x256xf32>
    %c0_19 = arith.constant 0 : index
    %c129 = arith.constant 129 : index
    %24 = vector.load %arg13[%c0_19, %c129] : memref<8x512xf32, #tpu.memory_space<vmem>>, vector<8x256xf32>
    %25 = vector.broadcast %16 : vector<8x1xf32> to vector<8x256xf32>
    %26 = arith.mulf %25, %24 : vector<8x256xf32>
    %27 = arith.addf %23, %26 : vector<8x256xf32>
    %c0_20 = arith.constant 0 : index
    %c0_21 = arith.constant 0 : index
    %c0_22 = arith.constant 0 : index
    %28 = vector.load %arg4[%c0_20, %c0_21, %c0_22] : memref<3x8x1xf32, #tpu.memory_space<vmem>>, vector<1x8x1xf32>
    %29 = vector.shape_cast %28 : vector<1x8x1xf32> to vector<8x1xf32>
    %30 = vector.broadcast %29 : vector<8x1xf32> to vector<8x256xf32>
    %31 = arith.addf %27, %30 : vector<8x256xf32>
    %c0_23 = arith.constant 0 : index
    %c0_24 = arith.constant 0 : index
    %c0_25 = arith.constant 0 : index
    %32 = vector.load %arg7[%c0_23, %c0_24, %c0_25] : memref<3x8x1xf32, #tpu.memory_space<vmem>>, vector<1x8x1xf32>
    %33 = vector.shape_cast %32 : vector<1x8x1xf32> to vector<8x1xf32>
    %c0_26 = arith.constant 0 : index
    %c0_27 = arith.constant 0 : index
    %c0_28 = arith.constant 0 : index
    %34 = vector.load %arg8[%c0_26, %c0_27, %c0_28] : memref<3x8x1xf32, #tpu.memory_space<vmem>>, vector<1x8x1xf32>
    %35 = vector.shape_cast %34 : vector<1x8x1xf32> to vector<8x1xf32>
    %cst_29 = arith.constant dense<0.000000e+00> : vector<256xf32>
    %36 = vector.multi_reduction <add>, %31, %cst_29 [0] : vector<8x256xf32> to vector<256xf32>
    %37 = vector.shape_cast %36 : vector<256xf32> to vector<1x256xf32>
    %38 = arith.mulf %31, %31 : vector<8x256xf32>
    %cst_30 = arith.constant dense<0.000000e+00> : vector<256xf32>
    %39 = vector.multi_reduction <add>, %38, %cst_30 [0] : vector<8x256xf32> to vector<256xf32>
    %40 = vector.shape_cast %39 : vector<256xf32> to vector<1x256xf32>
    %cst_31 = arith.constant 1.250000e-01 : f32
    %41 = vector.broadcast %cst_31 : f32 to vector<1x256xf32>
    %42 = arith.mulf %37, %41 : vector<1x256xf32>
    %cst_32 = arith.constant 1.250000e-01 : f32
    %43 = vector.broadcast %cst_32 : f32 to vector<1x256xf32>
    %44 = arith.mulf %40, %43 : vector<1x256xf32>
    %45 = arith.mulf %42, %42 : vector<1x256xf32>
    %46 = arith.subf %44, %45 : vector<1x256xf32>
    %47 = vector.broadcast %42 : vector<1x256xf32> to vector<8x256xf32>
    %48 = arith.subf %31, %47 : vector<8x256xf32>
    %cst_33 = arith.constant 9.99999974E-6 : f32
    %49 = vector.broadcast %cst_33 : f32 to vector<1x256xf32>
    %50 = arith.addf %46, %49 : vector<1x256xf32>
    %51 = math.rsqrt %50 : vector<1x256xf32>
    %52 = vector.broadcast %51 : vector<1x256xf32> to vector<8x256xf32>
    %53 = arith.mulf %48, %52 : vector<8x256xf32>
    %54 = vector.broadcast %33 : vector<8x1xf32> to vector<8x256xf32>
    %55 = arith.mulf %53, %54 : vector<8x256xf32>
    %56 = vector.broadcast %35 : vector<8x1xf32> to vector<8x256xf32>
    %57 = arith.addf %55, %56 : vector<8x256xf32>
    %cst_34 = arith.constant 5.000000e-01 : f32
    %58 = vector.broadcast %cst_34 : f32 to vector<8x256xf32>
    %59 = arith.mulf %58, %57 : vector<8x256xf32>
    %cst_35 = arith.constant 4.471500e-02 : f32
    %60 = vector.broadcast %cst_35 : f32 to vector<8x256xf32>
    %61 = arith.mulf %60, %57 : vector<8x256xf32>
    %62 = arith.mulf %61, %57 : vector<8x256xf32>
    %63 = arith.mulf %62, %57 : vector<8x256xf32>
    %64 = arith.addf %57, %63 : vector<8x256xf32>
    %cst_36 = arith.constant 0.797884583 : f32
    %65 = vector.broadcast %cst_36 : f32 to vector<8x256xf32>
    %66 = arith.mulf %65, %64 : vector<8x256xf32>
    %67 = math.tanh %66 : vector<8x256xf32>
    %cst_37 = arith.constant 1.000000e+00 : f32
    %68 = vector.broadcast %cst_37 : f32 to vector<8x256xf32>
    %69 = arith.addf %68, %67 : vector<8x256xf32>
    %70 = arith.mulf %59, %69 : vector<8x256xf32>
    %c0_38 = arith.constant 0 : index
    %c0_39 = arith.constant 0 : index
    %c0_40 = arith.constant 0 : index
    %71 = vector.load %arg5[%c0_38, %c0_39, %c0_40] : memref<3x8x8xbf16, #tpu.memory_space<vmem>>, vector<1x8x8xbf16>
    %72 = vector.shape_cast %71 : vector<1x8x8xbf16> to vector<8x8xbf16>
    %73 = arith.truncf %70 : vector<8x256xf32> to vector<8x256xbf16>
    %cst_41 = arith.constant dense<0.000000e+00> : vector<8x256xf32>
    %74 = tpu.matmul %72, %73, %cst_41 {dimension_numbers = #tpu.dot_dimension_numbers<[1], [0], [0], [1], [0, 0, 1, 1], [], []>} : vector<8x8xbf16>, vector<8x256xbf16>, vector<8x256xf32> -> vector<8x256xf32>
    %c0_42 = arith.constant 0 : index
    %c0_43 = arith.constant 0 : index
    %c0_44 = arith.constant 0 : index
    %75 = vector.load %arg6[%c0_42, %c0_43, %c0_44] : memref<3x8x1xf32, #tpu.memory_space<vmem>>, vector<1x8x1xf32>
    %76 = vector.shape_cast %75 : vector<1x8x1xf32> to vector<8x1xf32>
    %77 = vector.broadcast %76 : vector<8x1xf32> to vector<8x256xf32>
    %78 = arith.addf %74, %77 : vector<8x256xf32>
    %c0_45 = arith.constant 0 : index
    %c0_46 = arith.constant 0 : index
    %c0_47 = arith.constant 0 : index
    %79 = vector.load %arg9[%c0_45, %c0_46, %c0_47] : memref<3x8x1xf32, #tpu.memory_space<vmem>>, vector<1x8x1xf32>
    %80 = vector.shape_cast %79 : vector<1x8x1xf32> to vector<8x1xf32>
    %c0_48 = arith.constant 0 : index
    %c0_49 = arith.constant 0 : index
    %c0_50 = arith.constant 0 : index
    %81 = vector.load %arg10[%c0_48, %c0_49, %c0_50] : memref<3x8x1xf32, #tpu.memory_space<vmem>>, vector<1x8x1xf32>
    %82 = vector.shape_cast %81 : vector<1x8x1xf32> to vector<8x1xf32>
    %cst_51 = arith.constant dense<0.000000e+00> : vector<256xf32>
    %83 = vector.multi_reduction <add>, %78, %cst_51 [0] : vector<8x256xf32> to vector<256xf32>
    %84 = vector.shape_cast %83 : vector<256xf32> to vector<1x256xf32>
    %85 = arith.mulf %78, %78 : vector<8x256xf32>
    %cst_52 = arith.constant dense<0.000000e+00> : vector<256xf32>
    %86 = vector.multi_reduction <add>, %85, %cst_52 [0] : vector<8x256xf32> to vector<256xf32>
    %87 = vector.shape_cast %86 : vector<256xf32> to vector<1x256xf32>
    %cst_53 = arith.constant 1.250000e-01 : f32
    %88 = vector.broadcast %cst_53 : f32 to vector<1x256xf32>
    %89 = arith.mulf %84, %88 : vector<1x256xf32>
    %cst_54 = arith.constant 1.250000e-01 : f32
    %90 = vector.broadcast %cst_54 : f32 to vector<1x256xf32>
    %91 = arith.mulf %87, %90 : vector<1x256xf32>
    %92 = arith.mulf %89, %89 : vector<1x256xf32>
    %93 = arith.subf %91, %92 : vector<1x256xf32>
    %94 = vector.broadcast %89 : vector<1x256xf32> to vector<8x256xf32>
    %95 = arith.subf %78, %94 : vector<8x256xf32>
    %cst_55 = arith.constant 9.99999974E-6 : f32
    %96 = vector.broadcast %cst_55 : f32 to vector<1x256xf32>
    %97 = arith.addf %93, %96 : vector<1x256xf32>
    %98 = math.rsqrt %97 : vector<1x256xf32>
    %99 = vector.broadcast %98 : vector<1x256xf32> to vector<8x256xf32>
    %100 = arith.mulf %95, %99 : vector<8x256xf32>
    %101 = vector.broadcast %80 : vector<8x1xf32> to vector<8x256xf32>
    %102 = arith.mulf %100, %101 : vector<8x256xf32>
    %103 = vector.broadcast %82 : vector<8x1xf32> to vector<8x256xf32>
    %104 = arith.addf %102, %103 : vector<8x256xf32>
    %cst_56 = arith.constant 5.000000e-01 : f32
    %105 = vector.broadcast %cst_56 : f32 to vector<8x256xf32>
    %106 = arith.mulf %105, %104 : vector<8x256xf32>
    %cst_57 = arith.constant 4.471500e-02 : f32
    %107 = vector.broadcast %cst_57 : f32 to vector<8x256xf32>
    %108 = arith.mulf %107, %104 : vector<8x256xf32>
    %109 = arith.mulf %108, %104 : vector<8x256xf32>
    %110 = arith.mulf %109, %104 : vector<8x256xf32>
    %111 = arith.addf %104, %110 : vector<8x256xf32>
    %cst_58 = arith.constant 0.797884583 : f32
    %112 = vector.broadcast %cst_58 : f32 to vector<8x256xf32>
    %113 = arith.mulf %112, %111 : vector<8x256xf32>
    %114 = math.tanh %113 : vector<8x256xf32>
    %cst_59 = arith.constant 1.000000e+00 : f32
    %115 = vector.broadcast %cst_59 : f32 to vector<8x256xf32>
    %116 = arith.addf %115, %114 : vector<8x256xf32>
    %117 = arith.mulf %106, %116 : vector<8x256xf32>
    %c0_60 = arith.constant 0 : index
    %c0_61 = arith.constant 0 : index
    %118 = vector.load %arg12[%c0_60, %c0_61] : memref<8x256xf32, #tpu.memory_space<vmem>>, vector<8x256xf32>
    %119 = arith.addf %118, %117 : vector<8x256xf32>
    %c0_62 = arith.constant 0 : index
    %c0_63 = arith.constant 0 : index
    %120 = vector.load %arg12[%c0_62, %c0_63] : memref<8x256xf32, #tpu.memory_space<vmem>>, vector<8x256xf32>
    tpu.vector_store %arg12[%c0_62, %c0_63], %119 {strides = array<i32>} : memref<8x256xf32, #tpu.memory_space<vmem>>, vector<8x256xf32>,
    %c0_64 = arith.constant 0 : index
    %c0_65 = arith.constant 0 : index
    %121 = vector.load %arg12[%c0_64, %c0_65] : memref<8x256xf32, #tpu.memory_space<vmem>>, vector<8x256xf32>
    %122 = vector.broadcast %1 : vector<1x256xf32> to vector<8x256xf32>
    %123 = arith.mulf %121, %122 : vector<8x256xf32>
    %c0_66 = arith.constant 0 : index
    %c128_67 = arith.constant 128 : index
    %124 = vector.load %arg13[%c0_66, %c128_67] : memref<8x512xf32, #tpu.memory_space<vmem>>, vector<8x256xf32>
    tpu.vector_store %arg13[%c0_66, %c128_67], %123 {strides = array<i32>} : memref<8x512xf32, #tpu.memory_space<vmem>>, vector<8x256xf32>,
    %c1 = arith.constant 1 : index
    %c0_68 = arith.constant 0 : index
    %c0_69 = arith.constant 0 : index
    %125 = vector.load %arg3[%c1, %c0_68, %c0_69] : memref<3x8x3xf32, #tpu.memory_space<vmem>>, vector<1x8x3xf32>
    %126 = vector.shape_cast %125 : vector<1x8x3xf32> to vector<8x3xf32>
    %127 = vector.extract_strided_slice %126 {offsets = [0, 0], sizes = [8, 1], strides = [1, 1]} : vector<8x3xf32> to vector<8x1xf32>
    %128 = vector.extract_strided_slice %126 {offsets = [0, 1], sizes = [8, 1], strides = [1, 1]} : vector<8x3xf32> to vector<8x1xf32>
    %129 = vector.extract_strided_slice %126 {offsets = [0, 2], sizes = [8, 1], strides = [1, 1]} : vector<8x3xf32> to vector<8x1xf32>
    %c0_70 = arith.constant 0 : index
    %c128_71 = arith.constant 128 : index
    %130 = vector.load %arg13[%c0_70, %c128_71] : memref<8x512xf32, #tpu.memory_space<vmem>>, vector<8x256xf32>
    %131 = vector.broadcast %128 : vector<8x1xf32> to vector<8x256xf32>
    %132 = arith.mulf %131, %130 : vector<8x256xf32>
    %c0_72 = arith.constant 0 : index
    %c125 = arith.constant 125 : index
    %133 = vector.load %arg13[%c0_72, %c125] : memref<8x512xf32, #tpu.memory_space<vmem>>, vector<8x256xf32>
    %134 = vector.broadcast %127 : vector<8x1xf32> to vector<8x256xf32>
    %135 = arith.mulf %134, %133 : vector<8x256xf32>
    %136 = arith.addf %132, %135 : vector<8x256xf32>
    %c0_73 = arith.constant 0 : index
    %c131 = arith.constant 131 : index
    %137 = vector.load %arg13[%c0_73, %c131] : memref<8x512xf32, #tpu.memory_space<vmem>>, vector<8x256xf32>
    %138 = vector.broadcast %129 : vector<8x1xf32> to vector<8x256xf32>
    %139 = arith.mulf %138, %137 : vector<8x256xf32>
    %140 = arith.addf %136, %139 : vector<8x256xf32>
    %c1_74 = arith.constant 1 : index
    %c0_75 = arith.constant 0 : index
    %c0_76 = arith.constant 0 : index
    %141 = vector.load %arg4[%c1_74, %c0_75, %c0_76] : memref<3x8x1xf32, #tpu.memory_space<vmem>>, vector<1x8x1xf32>
    %142 = vector.shape_cast %141 : vector<1x8x1xf32> to vector<8x1xf32>
    %143 = vector.broadcast %142 : vector<8x1xf32> to vector<8x256xf32>
    %144 = arith.addf %140, %143 : vector<8x256xf32>
    %c1_77 = arith.constant 1 : index
    %c0_78 = arith.constant 0 : index
    %c0_79 = arith.constant 0 : index
    %145 = vector.load %arg7[%c1_77, %c0_78, %c0_79] : memref<3x8x1xf32, #tpu.memory_space<vmem>>, vector<1x8x1xf32>
    %146 = vector.shape_cast %145 : vector<1x8x1xf32> to vector<8x1xf32>
    %c1_80 = arith.constant 1 : index
    %c0_81 = arith.constant 0 : index
    %c0_82 = arith.constant 0 : index
    %147 = vector.load %arg8[%c1_80, %c0_81, %c0_82] : memref<3x8x1xf32, #tpu.memory_space<vmem>>, vector<1x8x1xf32>
    %148 = vector.shape_cast %147 : vector<1x8x1xf32> to vector<8x1xf32>
    %cst_83 = arith.constant dense<0.000000e+00> : vector<256xf32>
    %149 = vector.multi_reduction <add>, %144, %cst_83 [0] : vector<8x256xf32> to vector<256xf32>
    %150 = vector.shape_cast %149 : vector<256xf32> to vector<1x256xf32>
    %151 = arith.mulf %144, %144 : vector<8x256xf32>
    %cst_84 = arith.constant dense<0.000000e+00> : vector<256xf32>
    %152 = vector.multi_reduction <add>, %151, %cst_84 [0] : vector<8x256xf32> to vector<256xf32>
    %153 = vector.shape_cast %152 : vector<256xf32> to vector<1x256xf32>
    %cst_85 = arith.constant 1.250000e-01 : f32
    %154 = vector.broadcast %cst_85 : f32 to vector<1x256xf32>
    %155 = arith.mulf %150, %154 : vector<1x256xf32>
    %cst_86 = arith.constant 1.250000e-01 : f32
    %156 = vector.broadcast %cst_86 : f32 to vector<1x256xf32>
    %157 = arith.mulf %153, %156 : vector<1x256xf32>
    %158 = arith.mulf %155, %155 : vector<1x256xf32>
    %159 = arith.subf %157, %158 : vector<1x256xf32>
    %160 = vector.broadcast %155 : vector<1x256xf32> to vector<8x256xf32>
    %161 = arith.subf %144, %160 : vector<8x256xf32>
    %cst_87 = arith.constant 9.99999974E-6 : f32
    %162 = vector.broadcast %cst_87 : f32 to vector<1x256xf32>
    %163 = arith.addf %159, %162 : vector<1x256xf32>
    %164 = math.rsqrt %163 : vector<1x256xf32>
    %165 = vector.broadcast %164 : vector<1x256xf32> to vector<8x256xf32>
    %166 = arith.mulf %161, %165 : vector<8x256xf32>
    %167 = vector.broadcast %146 : vector<8x1xf32> to vector<8x256xf32>
    %168 = arith.mulf %166, %167 : vector<8x256xf32>
    %169 = vector.broadcast %148 : vector<8x1xf32> to vector<8x256xf32>
    %170 = arith.addf %168, %169 : vector<8x256xf32>
    %cst_88 = arith.constant 5.000000e-01 : f32
    %171 = vector.broadcast %cst_88 : f32 to vector<8x256xf32>
    %172 = arith.mulf %171, %170 : vector<8x256xf32>
    %cst_89 = arith.constant 4.471500e-02 : f32
    %173 = vector.broadcast %cst_89 : f32 to vector<8x256xf32>
    %174 = arith.mulf %173, %170 : vector<8x256xf32>
    %175 = arith.mulf %174, %170 : vector<8x256xf32>
    %176 = arith.mulf %175, %170 : vector<8x256xf32>
    %177 = arith.addf %170, %176 : vector<8x256xf32>
    %cst_90 = arith.constant 0.797884583 : f32
    %178 = vector.broadcast %cst_90 : f32 to vector<8x256xf32>
    %179 = arith.mulf %178, %177 : vector<8x256xf32>
    %180 = math.tanh %179 : vector<8x256xf32>
    %cst_91 = arith.constant 1.000000e+00 : f32
    %181 = vector.broadcast %cst_91 : f32 to vector<8x256xf32>
    %182 = arith.addf %181, %180 : vector<8x256xf32>
    %183 = arith.mulf %172, %182 : vector<8x256xf32>
    %c1_92 = arith.constant 1 : index
    %c0_93 = arith.constant 0 : index
    %c0_94 = arith.constant 0 : index
    %184 = vector.load %arg5[%c1_92, %c0_93, %c0_94] : memref<3x8x8xbf16, #tpu.memory_space<vmem>>, vector<1x8x8xbf16>
    %185 = vector.shape_cast %184 : vector<1x8x8xbf16> to vector<8x8xbf16>
    %186 = arith.truncf %183 : vector<8x256xf32> to vector<8x256xbf16>
    %cst_95 = arith.constant dense<0.000000e+00> : vector<8x256xf32>
    %187 = tpu.matmul %185, %186, %cst_95 {dimension_numbers = #tpu.dot_dimension_numbers<[1], [0], [0], [1], [0, 0, 1, 1], [], []>} : vector<8x8xbf16>, vector<8x256xbf16>, vector<8x256xf32> -> vector<8x256xf32>
    %c1_96 = arith.constant 1 : index
    %c0_97 = arith.constant 0 : index
    %c0_98 = arith.constant 0 : index
    %188 = vector.load %arg6[%c1_96, %c0_97, %c0_98] : memref<3x8x1xf32, #tpu.memory_space<vmem>>, vector<1x8x1xf32>
    %189 = vector.shape_cast %188 : vector<1x8x1xf32> to vector<8x1xf32>
    %190 = vector.broadcast %189 : vector<8x1xf32> to vector<8x256xf32>
    %191 = arith.addf %187, %190 : vector<8x256xf32>
    %c1_99 = arith.constant 1 : index
    %c0_100 = arith.constant 0 : index
    %c0_101 = arith.constant 0 : index
    %192 = vector.load %arg9[%c1_99, %c0_100, %c0_101] : memref<3x8x1xf32, #tpu.memory_space<vmem>>, vector<1x8x1xf32>
    %193 = vector.shape_cast %192 : vector<1x8x1xf32> to vector<8x1xf32>
    %c1_102 = arith.constant 1 : index
    %c0_103 = arith.constant 0 : index
    %c0_104 = arith.constant 0 : index
    %194 = vector.load %arg10[%c1_102, %c0_103, %c0_104] : memref<3x8x1xf32, #tpu.memory_space<vmem>>, vector<1x8x1xf32>
    %195 = vector.shape_cast %194 : vector<1x8x1xf32> to vector<8x1xf32>
    %cst_105 = arith.constant dense<0.000000e+00> : vector<256xf32>
    %196 = vector.multi_reduction <add>, %191, %cst_105 [0] : vector<8x256xf32> to vector<256xf32>
    %197 = vector.shape_cast %196 : vector<256xf32> to vector<1x256xf32>
    %198 = arith.mulf %191, %191 : vector<8x256xf32>
    %cst_106 = arith.constant dense<0.000000e+00> : vector<256xf32>
    %199 = vector.multi_reduction <add>, %198, %cst_106 [0] : vector<8x256xf32> to vector<256xf32>
    %200 = vector.shape_cast %199 : vector<256xf32> to vector<1x256xf32>
    %cst_107 = arith.constant 1.250000e-01 : f32
    %201 = vector.broadcast %cst_107 : f32 to vector<1x256xf32>
    %202 = arith.mulf %197, %201 : vector<1x256xf32>
    %cst_108 = arith.constant 1.250000e-01 : f32
    %203 = vector.broadcast %cst_108 : f32 to vector<1x256xf32>
    %204 = arith.mulf %200, %203 : vector<1x256xf32>
    %205 = arith.mulf %202, %202 : vector<1x256xf32>
    %206 = arith.subf %204, %205 : vector<1x256xf32>
    %207 = vector.broadcast %202 : vector<1x256xf32> to vector<8x256xf32>
    %208 = arith.subf %191, %207 : vector<8x256xf32>
    %cst_109 = arith.constant 9.99999974E-6 : f32
    %209 = vector.broadcast %cst_109 : f32 to vector<1x256xf32>
    %210 = arith.addf %206, %209 : vector<1x256xf32>
    %211 = math.rsqrt %210 : vector<1x256xf32>
    %212 = vector.broadcast %211 : vector<1x256xf32> to vector<8x256xf32>
    %213 = arith.mulf %208, %212 : vector<8x256xf32>
    %214 = vector.broadcast %193 : vector<8x1xf32> to vector<8x256xf32>
    %215 = arith.mulf %213, %214 : vector<8x256xf32>
    %216 = vector.broadcast %195 : vector<8x1xf32> to vector<8x256xf32>
    %217 = arith.addf %215, %216 : vector<8x256xf32>
    %cst_110 = arith.constant 5.000000e-01 : f32
    %218 = vector.broadcast %cst_110 : f32 to vector<8x256xf32>
    %219 = arith.mulf %218, %217 : vector<8x256xf32>
    %cst_111 = arith.constant 4.471500e-02 : f32
    %220 = vector.broadcast %cst_111 : f32 to vector<8x256xf32>
    %221 = arith.mulf %220, %217 : vector<8x256xf32>
    %222 = arith.mulf %221, %217 : vector<8x256xf32>
    %223 = arith.mulf %222, %217 : vector<8x256xf32>
    %224 = arith.addf %217, %223 : vector<8x256xf32>
    %cst_112 = arith.constant 0.797884583 : f32
    %225 = vector.broadcast %cst_112 : f32 to vector<8x256xf32>
    %226 = arith.mulf %225, %224 : vector<8x256xf32>
    %227 = math.tanh %226 : vector<8x256xf32>
    %cst_113 = arith.constant 1.000000e+00 : f32
    %228 = vector.broadcast %cst_113 : f32 to vector<8x256xf32>
    %229 = arith.addf %228, %227 : vector<8x256xf32>
    %230 = arith.mulf %219, %229 : vector<8x256xf32>
    %c0_114 = arith.constant 0 : index
    %c0_115 = arith.constant 0 : index
    %231 = vector.load %arg12[%c0_114, %c0_115] : memref<8x256xf32, #tpu.memory_space<vmem>>, vector<8x256xf32>
    %232 = arith.addf %231, %230 : vector<8x256xf32>
    %c0_116 = arith.constant 0 : index
    %c0_117 = arith.constant 0 : index
    %233 = vector.load %arg12[%c0_116, %c0_117] : memref<8x256xf32, #tpu.memory_space<vmem>>, vector<8x256xf32>
    tpu.vector_store %arg12[%c0_116, %c0_117], %232 {strides = array<i32>} : memref<8x256xf32, #tpu.memory_space<vmem>>, vector<8x256xf32>,
    %c0_118 = arith.constant 0 : index
    %c0_119 = arith.constant 0 : index
    %234 = vector.load %arg12[%c0_118, %c0_119] : memref<8x256xf32, #tpu.memory_space<vmem>>, vector<8x256xf32>
    %235 = vector.broadcast %1 : vector<1x256xf32> to vector<8x256xf32>
    %236 = arith.mulf %234, %235 : vector<8x256xf32>
    %c0_120 = arith.constant 0 : index
    %c128_121 = arith.constant 128 : index
    %237 = vector.load %arg13[%c0_120, %c128_121] : memref<8x512xf32, #tpu.memory_space<vmem>>, vector<8x256xf32>
    tpu.vector_store %arg13[%c0_120, %c128_121], %236 {strides = array<i32>} : memref<8x512xf32, #tpu.memory_space<vmem>>, vector<8x256xf32>,
    %c2 = arith.constant 2 : index
    %c0_122 = arith.constant 0 : index
    %c0_123 = arith.constant 0 : index
    %238 = vector.load %arg3[%c2, %c0_122, %c0_123] : memref<3x8x3xf32, #tpu.memory_space<vmem>>, vector<1x8x3xf32>
    %239 = vector.shape_cast %238 : vector<1x8x3xf32> to vector<8x3xf32>
    %240 = vector.extract_strided_slice %239 {offsets = [0, 0], sizes = [8, 1], strides = [1, 1]} : vector<8x3xf32> to vector<8x1xf32>
    %241 = vector.extract_strided_slice %239 {offsets = [0, 1], sizes = [8, 1], strides = [1, 1]} : vector<8x3xf32> to vector<8x1xf32>
    %242 = vector.extract_strided_slice %239 {offsets = [0, 2], sizes = [8, 1], strides = [1, 1]} : vector<8x3xf32> to vector<8x1xf32>
    %c0_124 = arith.constant 0 : index
    %c128_125 = arith.constant 128 : index
    %243 = vector.load %arg13[%c0_124, %c128_125] : memref<8x512xf32, #tpu.memory_space<vmem>>, vector<8x256xf32>
    %244 = vector.broadcast %241 : vector<8x1xf32> to vector<8x256xf32>
    %245 = arith.mulf %244, %243 : vector<8x256xf32>
    %c0_126 = arith.constant 0 : index
    %c119 = arith.constant 119 : index
    %246 = vector.load %arg13[%c0_126, %c119] : memref<8x512xf32, #tpu.memory_space<vmem>>, vector<8x256xf32>
    %247 = vector.broadcast %240 : vector<8x1xf32> to vector<8x256xf32>
    %248 = arith.mulf %247, %246 : vector<8x256xf32>
    %249 = arith.addf %245, %248 : vector<8x256xf32>
    %c0_127 = arith.constant 0 : index
    %c137 = arith.constant 137 : index
    %250 = vector.load %arg13[%c0_127, %c137] : memref<8x512xf32, #tpu.memory_space<vmem>>, vector<8x256xf32>
    %251 = vector.broadcast %242 : vector<8x1xf32> to vector<8x256xf32>
    %252 = arith.mulf %251, %250 : vector<8x256xf32>
    %253 = arith.addf %249, %252 : vector<8x256xf32>
    %c2_128 = arith.constant 2 : index
    %c0_129 = arith.constant 0 : index
    %c0_130 = arith.constant 0 : index
    %254 = vector.load %arg4[%c2_128, %c0_129, %c0_130] : memref<3x8x1xf32, #tpu.memory_space<vmem>>, vector<1x8x1xf32>
    %255 = vector.shape_cast %254 : vector<1x8x1xf32> to vector<8x1xf32>
    %256 = vector.broadcast %255 : vector<8x1xf32> to vector<8x256xf32>
    %257 = arith.addf %253, %256 : vector<8x256xf32>
    %c2_131 = arith.constant 2 : index
    %c0_132 = arith.constant 0 : index
    %c0_133 = arith.constant 0 : index
    %258 = vector.load %arg7[%c2_131, %c0_132, %c0_133] : memref<3x8x1xf32, #tpu.memory_space<vmem>>, vector<1x8x1xf32>
    %259 = vector.shape_cast %258 : vector<1x8x1xf32> to vector<8x1xf32>
    %c2_134 = arith.constant 2 : index
    %c0_135 = arith.constant 0 : index
    %c0_136 = arith.constant 0 : index
    %260 = vector.load %arg8[%c2_134, %c0_135, %c0_136] : memref<3x8x1xf32, #tpu.memory_space<vmem>>, vector<1x8x1xf32>
    %261 = vector.shape_cast %260 : vector<1x8x1xf32> to vector<8x1xf32>
    %cst_137 = arith.constant dense<0.000000e+00> : vector<256xf32>
    %262 = vector.multi_reduction <add>, %257, %cst_137 [0] : vector<8x256xf32> to vector<256xf32>
    %263 = vector.shape_cast %262 : vector<256xf32> to vector<1x256xf32>
    %264 = arith.mulf %257, %257 : vector<8x256xf32>
    %cst_138 = arith.constant dense<0.000000e+00> : vector<256xf32>
    %265 = vector.multi_reduction <add>, %264, %cst_138 [0] : vector<8x256xf32> to vector<256xf32>
    %266 = vector.shape_cast %265 : vector<256xf32> to vector<1x256xf32>
    %cst_139 = arith.constant 1.250000e-01 : f32
    %267 = vector.broadcast %cst_139 : f32 to vector<1x256xf32>
    %268 = arith.mulf %263, %267 : vector<1x256xf32>
    %cst_140 = arith.constant 1.250000e-01 : f32
    %269 = vector.broadcast %cst_140 : f32 to vector<1x256xf32>
    %270 = arith.mulf %266, %269 : vector<1x256xf32>
    %271 = arith.mulf %268, %268 : vector<1x256xf32>
    %272 = arith.subf %270, %271 : vector<1x256xf32>
    %273 = vector.broadcast %268 : vector<1x256xf32> to vector<8x256xf32>
    %274 = arith.subf %257, %273 : vector<8x256xf32>
    %cst_141 = arith.constant 9.99999974E-6 : f32
    %275 = vector.broadcast %cst_141 : f32 to vector<1x256xf32>
    %276 = arith.addf %272, %275 : vector<1x256xf32>
    %277 = math.rsqrt %276 : vector<1x256xf32>
    %278 = vector.broadcast %277 : vector<1x256xf32> to vector<8x256xf32>
    %279 = arith.mulf %274, %278 : vector<8x256xf32>
    %280 = vector.broadcast %259 : vector<8x1xf32> to vector<8x256xf32>
    %281 = arith.mulf %279, %280 : vector<8x256xf32>
    %282 = vector.broadcast %261 : vector<8x1xf32> to vector<8x256xf32>
    %283 = arith.addf %281, %282 : vector<8x256xf32>
    %cst_142 = arith.constant 5.000000e-01 : f32
    %284 = vector.broadcast %cst_142 : f32 to vector<8x256xf32>
    %285 = arith.mulf %284, %283 : vector<8x256xf32>
    %cst_143 = arith.constant 4.471500e-02 : f32
    %286 = vector.broadcast %cst_143 : f32 to vector<8x256xf32>
    %287 = arith.mulf %286, %283 : vector<8x256xf32>
    %288 = arith.mulf %287, %283 : vector<8x256xf32>
    %289 = arith.mulf %288, %283 : vector<8x256xf32>
    %290 = arith.addf %283, %289 : vector<8x256xf32>
    %cst_144 = arith.constant 0.797884583 : f32
    %291 = vector.broadcast %cst_144 : f32 to vector<8x256xf32>
    %292 = arith.mulf %291, %290 : vector<8x256xf32>
    %293 = math.tanh %292 : vector<8x256xf32>
    %cst_145 = arith.constant 1.000000e+00 : f32
    %294 = vector.broadcast %cst_145 : f32 to vector<8x256xf32>
    %295 = arith.addf %294, %293 : vector<8x256xf32>
    %296 = arith.mulf %285, %295 : vector<8x256xf32>
    %c2_146 = arith.constant 2 : index
    %c0_147 = arith.constant 0 : index
    %c0_148 = arith.constant 0 : index
    %297 = vector.load %arg5[%c2_146, %c0_147, %c0_148] : memref<3x8x8xbf16, #tpu.memory_space<vmem>>, vector<1x8x8xbf16>
    %298 = vector.shape_cast %297 : vector<1x8x8xbf16> to vector<8x8xbf16>
    %299 = arith.truncf %296 : vector<8x256xf32> to vector<8x256xbf16>
    %cst_149 = arith.constant dense<0.000000e+00> : vector<8x256xf32>
    %300 = tpu.matmul %298, %299, %cst_149 {dimension_numbers = #tpu.dot_dimension_numbers<[1], [0], [0], [1], [0, 0, 1, 1], [], []>} : vector<8x8xbf16>, vector<8x256xbf16>, vector<8x256xf32> -> vector<8x256xf32>
    %c2_150 = arith.constant 2 : index
    %c0_151 = arith.constant 0 : index
    %c0_152 = arith.constant 0 : index
    %301 = vector.load %arg6[%c2_150, %c0_151, %c0_152] : memref<3x8x1xf32, #tpu.memory_space<vmem>>, vector<1x8x1xf32>
    %302 = vector.shape_cast %301 : vector<1x8x1xf32> to vector<8x1xf32>
    %303 = vector.broadcast %302 : vector<8x1xf32> to vector<8x256xf32>
    %304 = arith.addf %300, %303 : vector<8x256xf32>
    %c2_153 = arith.constant 2 : index
    %c0_154 = arith.constant 0 : index
    %c0_155 = arith.constant 0 : index
    %305 = vector.load %arg9[%c2_153, %c0_154, %c0_155] : memref<3x8x1xf32, #tpu.memory_space<vmem>>, vector<1x8x1xf32>
    %306 = vector.shape_cast %305 : vector<1x8x1xf32> to vector<8x1xf32>
    %c2_156 = arith.constant 2 : index
    %c0_157 = arith.constant 0 : index
    %c0_158 = arith.constant 0 : index
    %307 = vector.load %arg10[%c2_156, %c0_157, %c0_158] : memref<3x8x1xf32, #tpu.memory_space<vmem>>, vector<1x8x1xf32>
    %308 = vector.shape_cast %307 : vector<1x8x1xf32> to vector<8x1xf32>
    %cst_159 = arith.constant dense<0.000000e+00> : vector<256xf32>
    %309 = vector.multi_reduction <add>, %304, %cst_159 [0] : vector<8x256xf32> to vector<256xf32>
    %310 = vector.shape_cast %309 : vector<256xf32> to vector<1x256xf32>
    %311 = arith.mulf %304, %304 : vector<8x256xf32>
    %cst_160 = arith.constant dense<0.000000e+00> : vector<256xf32>
    %312 = vector.multi_reduction <add>, %311, %cst_160 [0] : vector<8x256xf32> to vector<256xf32>
    %313 = vector.shape_cast %312 : vector<256xf32> to vector<1x256xf32>
    %cst_161 = arith.constant 1.250000e-01 : f32
    %314 = vector.broadcast %cst_161 : f32 to vector<1x256xf32>
    %315 = arith.mulf %310, %314 : vector<1x256xf32>
    %cst_162 = arith.constant 1.250000e-01 : f32
    %316 = vector.broadcast %cst_162 : f32 to vector<1x256xf32>
    %317 = arith.mulf %313, %316 : vector<1x256xf32>
    %318 = arith.mulf %315, %315 : vector<1x256xf32>
    %319 = arith.subf %317, %318 : vector<1x256xf32>
    %320 = vector.broadcast %315 : vector<1x256xf32> to vector<8x256xf32>
    %321 = arith.subf %304, %320 : vector<8x256xf32>
    %cst_163 = arith.constant 9.99999974E-6 : f32
    %322 = vector.broadcast %cst_163 : f32 to vector<1x256xf32>
    %323 = arith.addf %319, %322 : vector<1x256xf32>
    %324 = math.rsqrt %323 : vector<1x256xf32>
    %325 = vector.broadcast %324 : vector<1x256xf32> to vector<8x256xf32>
    %326 = arith.mulf %321, %325 : vector<8x256xf32>
    %327 = vector.broadcast %306 : vector<8x1xf32> to vector<8x256xf32>
    %328 = arith.mulf %326, %327 : vector<8x256xf32>
    %329 = vector.broadcast %308 : vector<8x1xf32> to vector<8x256xf32>
    %330 = arith.addf %328, %329 : vector<8x256xf32>
    %cst_164 = arith.constant 5.000000e-01 : f32
    %331 = vector.broadcast %cst_164 : f32 to vector<8x256xf32>
    %332 = arith.mulf %331, %330 : vector<8x256xf32>
    %cst_165 = arith.constant 4.471500e-02 : f32
    %333 = vector.broadcast %cst_165 : f32 to vector<8x256xf32>
    %334 = arith.mulf %333, %330 : vector<8x256xf32>
    %335 = arith.mulf %334, %330 : vector<8x256xf32>
    %336 = arith.mulf %335, %330 : vector<8x256xf32>
    %337 = arith.addf %330, %336 : vector<8x256xf32>
    %cst_166 = arith.constant 0.797884583 : f32
    %338 = vector.broadcast %cst_166 : f32 to vector<8x256xf32>
    %339 = arith.mulf %338, %337 : vector<8x256xf32>
    %340 = math.tanh %339 : vector<8x256xf32>
    %cst_167 = arith.constant 1.000000e+00 : f32
    %341 = vector.broadcast %cst_167 : f32 to vector<8x256xf32>
    %342 = arith.addf %341, %340 : vector<8x256xf32>
    %343 = arith.mulf %332, %342 : vector<8x256xf32>
    %c0_168 = arith.constant 0 : index
    %c0_169 = arith.constant 0 : index
    %344 = vector.load %arg12[%c0_168, %c0_169] : memref<8x256xf32, #tpu.memory_space<vmem>>, vector<8x256xf32>
    %345 = arith.addf %344, %343 : vector<8x256xf32>
    %c0_170 = arith.constant 0 : index
    %c0_171 = arith.constant 0 : index
    %346 = vector.load %arg12[%c0_170, %c0_171] : memref<8x256xf32, #tpu.memory_space<vmem>>, vector<8x256xf32>
    tpu.vector_store %arg12[%c0_170, %c0_171], %345 {strides = array<i32>} : memref<8x256xf32, #tpu.memory_space<vmem>>, vector<8x256xf32>,
    %c0_172 = arith.constant 0 : index
    %c0_173 = arith.constant 0 : index
    %347 = vector.load %arg12[%c0_172, %c0_173] : memref<8x256xf32, #tpu.memory_space<vmem>>, vector<8x256xf32>
    %348 = vector.broadcast %1 : vector<1x256xf32> to vector<8x256xf32>
    %349 = arith.mulf %347, %348 : vector<8x256xf32>
    %c0_174 = arith.constant 0 : index
    %c0_175 = arith.constant 0 : index
    %c0_176 = arith.constant 0 : index
    %350 = vector.load %arg11[%c0_174, %c0_175, %c0_176] : memref<1x8x256xf32, #tpu.memory_space<vmem>>, vector<1x8x256xf32>
    %351 = vector.shape_cast %350 : vector<1x8x256xf32> to vector<8x256xf32>
    %352 = vector.shape_cast %349 : vector<8x256xf32> to vector<1x8x256xf32>
    tpu.vector_store %arg11[%c0_174, %c0_175, %c0_176], %352 {strides = array<i32>} : memref<1x8x256xf32, #tpu.memory_space<vmem>>, vector<1x8x256xf32>,
    return
  }
  func.func @transform_0(%arg0: i32) -> (i32, i32, i32) {
    %c0_i32 = arith.constant 0 : i32
    %c0_i32_0 = arith.constant 0 : i32
    %c0_i32_1 = arith.constant 0 : i32
    return %arg0, %c0_i32, %c0_i32_0 : i32, i32, i32
  }
  func.func @transform_1(%arg0: i32) -> (i32, i32, i32) {
    %c0_i32 = arith.constant 0 : i32
    %c0_i32_0 = arith.constant 0 : i32
    %c0_i32_1 = arith.constant 0 : i32
    return %arg0, %c0_i32, %c0_i32_0 : i32, i32, i32
  }
  func.func @transform_2(%arg0: i32) -> (i32, i32, i32) {
    %c0_i32 = arith.constant 0 : i32
    %c0_i32_0 = arith.constant 0 : i32
    %c0_i32_1 = arith.constant 0 : i32
    %c0_i32_2 = arith.constant 0 : i32
    return %c0_i32, %c0_i32_0, %c0_i32_1 : i32, i32, i32
  }
  func.func @transform_3(%arg0: i32) -> (i32, i32, i32) {
    %c0_i32 = arith.constant 0 : i32
    %c0_i32_0 = arith.constant 0 : i32
    %c0_i32_1 = arith.constant 0 : i32
    %c0_i32_2 = arith.constant 0 : i32
    return %c0_i32, %c0_i32_0, %c0_i32_1 : i32, i32, i32
  }
  func.func @transform_4(%arg0: i32) -> (i32, i32, i32) {
    %c0_i32 = arith.constant 0 : i32
    %c0_i32_0 = arith.constant 0 : i32
    %c0_i32_1 = arith.constant 0 : i32
    %c0_i32_2 = arith.constant 0 : i32
    return %c0_i32, %c0_i32_0, %c0_i32_1 : i32, i32, i32
  }
  func.func @transform_5(%arg0: i32) -> (i32, i32, i32) {
    %c0_i32 = arith.constant 0 : i32
    %c0_i32_0 = arith.constant 0 : i32
    %c0_i32_1 = arith.constant 0 : i32
    %c0_i32_2 = arith.constant 0 : i32
    return %c0_i32, %c0_i32_0, %c0_i32_1 : i32, i32, i32
  }
  func.func @transform_6(%arg0: i32) -> (i32, i32, i32) {
    %c0_i32 = arith.constant 0 : i32
    %c0_i32_0 = arith.constant 0 : i32
    %c0_i32_1 = arith.constant 0 : i32
    %c0_i32_2 = arith.constant 0 : i32
    return %c0_i32, %c0_i32_0, %c0_i32_1 : i32, i32, i32
  }
  func.func @transform_7(%arg0: i32) -> (i32, i32, i32) {
    %c0_i32 = arith.constant 0 : i32
    %c0_i32_0 = arith.constant 0 : i32
    %c0_i32_1 = arith.constant 0 : i32
    %c0_i32_2 = arith.constant 0 : i32
    return %c0_i32, %c0_i32_0, %c0_i32_1 : i32, i32, i32
  }
  func.func @transform_8(%arg0: i32) -> (i32, i32, i32) {
    %c0_i32 = arith.constant 0 : i32
    %c0_i32_0 = arith.constant 0 : i32
    %c0_i32_1 = arith.constant 0 : i32
    %c0_i32_2 = arith.constant 0 : i32
    return %c0_i32, %c0_i32_0, %c0_i32_1 : i32, i32, i32
  }
  func.func @transform_9(%arg0: i32) -> (i32, i32, i32) {
    %c0_i32 = arith.constant 0 : i32
    %c0_i32_0 = arith.constant 0 : i32
    %c0_i32_1 = arith.constant 0 : i32
    %c0_i32_2 = arith.constant 0 : i32
    return %c0_i32, %c0_i32_0, %c0_i32_1 : i32, i32, i32
  }
  func.func @transform_10(%arg0: i32) -> (i32, i32, i32) {
    %c0_i32 = arith.constant 0 : i32
    %c0_i32_0 = arith.constant 0 : i32
    %c0_i32_1 = arith.constant 0 : i32
    return %arg0, %c0_i32, %c0_i32_0 : i32, i32, i32
  }
}

</mosaic_0001>

<bundles_post_ra>
// kernel: tpu_custom_call.1
= control target key start
LH: loop header
LB: loop body
LE: loop exit
PB: predicated region body
PF: predicated region fallthrough
CT: control target
= control target key end

     0   :  { %15 = vsyncpa [#allocation5], 0  ;;  %s2023_s0 = inlined_call_operand.vmem [shape: f32[2,8,256], index: 0, kind: input, shape index: {}]   ;;  %s2024_s1 = inlined_call_operand.vmem [shape: f32[2,1,256], index: 1, kind: input, shape index: {}]   ;;  %s2025_s2 = inlined_call_operand.vmem [shape: f32[3,8,3], index: 2, kind: input, shape index: {}]   ;;  %s2026_s3 = inlined_call_operand.vmem [shape: f32[3,8,1], index: 3, kind: input, shape index: {}]   ;;  %s2027_s4 = inlined_call_operand.vmem [shape: bf16[3,8,8], index: 4, kind: input, shape index: {}]   ;;  %s2028_s5 = inlined_call_operand.vmem [shape: f32[3,8,1], index: 5, kind: input, shape index: {}]   ;;  %s2029_s6 = inlined_call_operand.vmem [shape: f32[3,8,1], index: 6, kind: input, shape index: {}]   ;;  %s2030_s7 = inlined_call_operand.vmem [shape: f32[3,8,1], index: 7, kind: input, shape index: {}]   ;;  %s2031_s8 = inlined_call_operand.vmem [shape: f32[3,8,1], index: 8, kind: input, shape index: {}]   ;;  %s2032_s9 = inlined_call_operand.vmem [shape: f32[3,8,1], index: 9, kind: input, shape index: {}]   ;;  %s2033_s10 = inlined_call_operand.hbm [shape: f32[2,8,256], index: 10, kind: output, shape index: {}]  }
   0x1   :  { %17 = vsyncpa [#allocation5 + $0x1], 0  ;;  %s1711_s13 = smov 0   ;;  %s1713_s14 = smov 0  }
   0x2   :  { %s1715_s15 = smov 0   ;;  %s1717_s16 = smov 0  }
   0x3 LB: > { %s1732_s17 = sadd.s32 4294967295, %s1645_s16   ;;  %s1436_s18 = sadd.s32 4294967294, %s1645_s16   ;;  %s1645_s16 = sphi %s1717_s16, %s2039_s16   ;;  %s1641_s15 = sphi %s1715_s15, %s2038_s15   ;;  %s1637_s14 = sphi %s1713_s14, %s2037_s14   ;;  %s1633_s13 = sphi %s1711_s13, %s2036_s13  }
   0x4   : > { %s1736_s19 = sadd.s32 1, %s1645_s16   ;;  %s250_s20 = sadd.s32 1, %s1641_s15 }
   0x5   : > { %s247_s21 = ssub.s32 %s1645_s16, %s1736_s19  ;;  %p260_p0 = scmp.ne.s32.totalorder %s1641_s15, %s1637_s14 }
   0x6   : > { %p248_p1 = scmp.eq.s32.totalorder %s247_s21, 0  ;;  %p261_p2 = scmp.eq.s32.totalorder %s1732_s17, 1 }
   0x7   : > { %p266_p3 = scmp.ne.s32.totalorder %s1637_s14, %s1633_s13  ;;  %p267_p4 = scmp.eq.s32.totalorder %s1436_s18, 1 }
   0x8   : > { %s1747_s22 = scalar_select %p248_p1, %s1641_s15, %s250_s20  }
   0x9   : > { %p1749_p5 = por %p261_p2, %p260_p0  ;;  %p1753_p6 = por %p267_p4, %p266_p3 }
   0xa   : > { %p1439_p7 = scmp.ge.s32.totalorder %s1645_s16, 1  ;;  %p324_p8 = scmp.lt.s32.totalorder %s1645_s16, 3 }
   0xc   : > { %p325_p9 = pnand %p1439_p7, %p324_p8 }
   0xd   : > { %p366_p10 = scmp.lt.s32.totalorder (!%p325_p9), %s1732_s17, 1  ;;  %s1650_s25 = smov (!%p325_p9), 1  }
   0xe   : > { %328 = sbr.rel (%p325_p9) target bundleno = 1346 (0x542), region = 60  ;;  %s1651_s26 = smov (!%p325_p9), 127  }
   0xf   : > { %s1652_s30 = smov (!%p325_p9), 3   ;;  %s1653_s18 = smov (!%p325_p9), 125  }
  0x10   : > { %s1655_s29 = smov (!%p325_p9), 119  }
  0x13   : > { %v394_v0 = vld [vmem:[%s2025_s2] sm:$0xff]  ;;  %v1647_v1 = vmov 0   ;;  %v1648_v2 = vmov 1   ;;  %v1649_v3 = vmov 2   ;;  %s367_s27 = scalar_select %p366_p10, %s1732_s17, 1  ;;  %v1446_v23 = vld [vmem:[%s2025_s2 + $0x8] sm:$0xff] }
  0x14   : > { %1521 = vset.pattern.permute.xlu0 %v1647_v1  ;;  %1523 = vset.pattern.permute.xlu1 %v1648_v2  ;;  %v454_v19 = vld [vmem:[%s2026_s3] sm:$0xff]  ;;  %vm421_vm0 = vcmask 7168   ;;  %vm447_vm1 = vcmask 1039360   ;;  %vm569_vm8 = vcmask 1043456   ;;  %vm565_vm9 = vcmask 64512  }
  0x15   : > { %406 = vperm.xlu0 %1521, %v394_v0   ;;  %399 = vperm.xlu1 %1523, %v394_v0   ;;  %s1443_s28 = sshll.u32 %s367_s27, 1  ;;  %s1471_s12 = sshll.u32 %s367_s27, 4  ;;  %v463_v20 = vld [vmem:[%s2030_s7] sm:$0xff] }
  0x16   : > { %1525 = vset.pattern.permute.xlu2 %v1647_v1  ;;  %s374_s11 = scalar_lea.vmem %s2024_s1, %s1443_s28  ;;  %s370_s21 = scalar_lea.vmem %s2023_s0, %s1471_s12  ;;  %v462_v21 = vld [vmem:[%s2029_s6] sm:$0xff] }
  0x17   : > { %v376_v4 = vld [vmem:[%s374_s11] sm:$0x3]  ;;  %v1784_v12 = vld [vmem:[%s370_s21 + $0x8] sm:$0xff] }
  0x18   : > { %v1776_v5 = vperm.slane %v376_v4, 0  ;;  %v1778_v6 = vld [vmem:[%s370_s21] sm:$0xff]  ;;  %v1782_v9 = vperm.slane %v376_v4, 1  ;;  %s1472_s21 = sshll.u32 %s1732_s17, 4 }
  0x19   : > { %v559_v22 = vld [vmem:[%s2028_s5] sm:$0xff]  ;;  %s1360_s28 = scalar_lea.hbm %s2033_s10, %s1472_s21 }
  0x1a   : > { %v390_v7 = vmul.f32 %v1776_v5, %v1778_v6  ;;  %v391_v13 = vmul.f32 %v1782_v9, %v1784_v12  ;;  %v602_v24 = vld [vmem:[%s2031_s8] sm:$0xff]  ;;  %s1364_s11 = sshll.u32 %s1360_s28, 4  ;;  %s1365_s11 = int_to_ptr.hbm [resolvable:$true] %s1364_s11 }
  0x1b   : > { %v603_v25 = vld [vmem:[%s2032_s9] sm:$0xff] }
  0x1d   : > { %1522 = vset.pattern.permute.xlu0 %v1649_v3  ;;  %1524 = vset.pattern.permute.xlu1 %v1647_v1 }
  0x1e   : > { %432 = vperm.xlu0 %1522, %v394_v0  }
  0x26   : > { %1526 = vset.pattern.permute.xlu0 %v1647_v1 }
  0x87   : > { %v407_v8 = vpop.permute.xlu0 %406  ;;  %v400_v27 = vpop.permute.xlu1 %399 }
  0x88   : > { %v409_v10 = vmul.f32 0.0, %v407_v8  ;;  %v410_v11 = vmul.f32 %v407_v8, %v390_v7  ;;  %v411_v14 = vmul.f32 %v407_v8, %v391_v13  ;;  %v403_v32 = vmul.f32 %v400_v27, %v391_v13 }
  0x89   : > { %v402_v37 = vmul.f32 %v400_v27, %v390_v7 }
  0x8a   : > { %415 = vrot.lane.b32.xlu1 %v409_v10, %s1650_s25  ;;  %417 = vrot.lane.b32.xlu2 %v410_v11, %s1650_s25 }
  0x90   : > { %v433_v15 = vpop.permute.xlu0 %432 }
  0x91   : > { %v435_v16 = vmul.f32 %v433_v15, %v390_v7  ;;  %v437_v17 = vmul.f32 0.0, %v433_v15  ;;  %v436_v18 = vmul.f32 %v433_v15, %v391_v13 }
  0x92   : > { %419 = vrot.lane.b32.xlu2 %v411_v14, %s1650_s25 }
  0x93   : > { %445 = vrot.lane.b32.xlu0 %v437_v17, %s1651_s26  ;;  %441 = vrot.lane.b32.xlu1 %v435_v16, %s1651_s26 }
  0x9a   : > { %443 = vrot.lane.b32.xlu2 %v436_v18, %s1651_s26  ;;  %s1654_s26 = smov 9  }
  0x9b   : > { %457 = vperm.xlu1 %1524, %v454_v19   ;;  %533 = vperm.xlu0 %1526, %v463_v20  }
  0xa2   : > { %526 = vperm.xlu2 %1525, %v462_v21  }
  0xa3   : > { %562 = vperm.xlu1 %1524, %v559_v22   ;;  %1527 = vset.pattern.permute.xlu0 %v1649_v3 }
  0xa4   : > { %747 = vperm.xlu0 %1527, %v1446_v23  }
  0xaa   : > { %666 = vperm.xlu2 %1525, %v602_v24  }
  0xab   : > { %673 = vperm.xlu1 %1524, %v603_v25  }
  0xac   : > { %1529 = vset.pattern.permute.xlu0 %v1647_v1 }
  0xb2   : > { %721 = vperm.xlu2 %1525, %v1446_v23  }
  0xb3   : > { %1528 = vset.pattern.permute.xlu1 %v1648_v2 }
  0xb4   : > { %714 = vperm.xlu1 %1528, %v1446_v23  }
  0xbc   : > { %1530 = vset.pattern.permute.xlu1 %v1647_v1 }
  0xe4   : > { %v418_v26 = vpop.permute.xlu2 %417 }
  0xec   : > { %v420_v28 = vpop.permute.xlu2 %419 }
  0xed   : > { %v423_v34 = vsel %vm421_vm0, %v418_v26, %v420_v28 }
  0xee   : > { %v427_v40 = vadd.f32 %v423_v34, %v403_v32 }
  0xf4   : > { %v444_v30 = vpop.permute.xlu2 %443 }
  0xfc   : > { %v416_v29 = vpop.permute.xlu1 %415  ;;  %v1813_v36 = vpop.permute.xlu2 %526 }
  0xfd   : > { %v422_v35 = vsel %vm421_vm0, %v416_v29, %v418_v26  ;;  %vm736_vm0 = vcmask 23552  }
  0xfe   : > { %v426_v41 = vadd.f32 %v422_v35, %v402_v37 }
 0x104   : > { %v1825_v51 = vpop.permute.xlu2 %666 }
 0x105   : > { %v442_v31 = vpop.permute.xlu1 %441  ;;  %v446_v33 = vpop.permute.xlu0 %445 }
 0x106   : > { %v449_v38 = vsel %vm447_vm1, %v444_v30, %v446_v33  ;;  %v448_v39 = vsel %vm447_vm1, %v442_v31, %v444_v30  ;;  %vm762_vm1 = vcmask 1022976  }
 0x107   : > { %v453_v42 = vadd.f32 %v449_v38, %v427_v40  ;;  %v452_v43 = vadd.f32 %v448_v39, %v426_v41 }
 0x10c   : > { %v1829_v10 = vpop.permute.xlu2 %721 }
 0x10d   : > { %v458_v44 = vpop.permute.xlu1 %457  ;;  %v724_v11 = vmul.f32 0.0, %v1829_v10 }
 0x10e   : > { %v1815_v45 = vadd.f32 %v458_v44, %v452_v43  ;;  %v1817_v46 = vadd.f32 %v458_v44, %v453_v42 }
 0x10f   : > { %730 = vrot.lane.b32.xlu2 %v724_v11, %s1652_s30 }
 0x110   : > { %v464_v47 = vrot.slane %v1815_v45, 4  ;;  %v470_v48 = vrot.slane %v1817_v46, 4  ;;  %v476_v49 = vmul.f32 %v1815_v45, %v1815_v45  ;;  %v477_v50 = vmul.f32 %v1817_v46, %v1817_v46 }
 0x112   : > { %v465_v52 = vadd.f32 %v464_v47, %v1815_v45  ;;  %v471_v53 = vadd.f32 %v470_v48, %v1817_v46  ;;  %v478_v54 = vrot.slane %v476_v49, 4  ;;  %v484_v55 = vrot.slane %v477_v50, 4 }
 0x114   : > { %v466_v56 = vrot.slane %v465_v52, 2  ;;  %v472_v57 = vrot.slane %v471_v53, 2  ;;  %v479_v58 = vadd.f32 %v478_v54, %v476_v49  ;;  %v485_v59 = vadd.f32 %v484_v55, %v477_v50  ;;  %v534_v50 = vpop.permute.xlu0 %533 }
 0x116   : > { %v480_v60 = vrot.slane %v479_v58, 2  ;;  %v486_v61 = vrot.slane %v485_v59, 2  ;;  %v473_v62 = vadd.f32 %v472_v57, %v471_v53  ;;  %v467_v63 = vadd.f32 %v466_v56, %v465_v52 }
 0x118   : > { %v481_v0 = vadd.f32 %v480_v60, %v479_v58  ;;  %v487_v4 = vadd.f32 %v486_v61, %v485_v59  ;;  %v474_v7 = vrot.slane %v473_v62, 1  ;;  %v468_v8 = vrot.slane %v467_v63, 1 }
 0x11a   : > { %v482_v13 = vrot.slane %v481_v0, 1  ;;  %v488_v14 = vrot.slane %v487_v4, 1  ;;  %v475_v15 = vadd.f32 %v474_v7, %v473_v62  ;;  %v469_v16 = vadd.f32 %v468_v8, %v467_v63 }
 0x11c   : > { %v489_v17 = vadd.f32 %v488_v14, %v487_v4  ;;  %v491_v18 = vmul.f32 0.125, %v475_v15  ;;  %v483_v19 = vadd.f32 %v482_v13, %v481_v0  ;;  %v490_v20 = vmul.f32 0.125, %v469_v16 }
 0x11e   : > { %v493_v21 = vmul.f32 0.125, %v489_v17  ;;  %v495_v22 = vmul.f32 %v491_v18, %v491_v18  ;;  %v492_v23 = vmul.f32 0.125, %v483_v19  ;;  %v494_v24 = vmul.f32 %v490_v20, %v490_v20  ;;  %v556_v19 = vld [vmem:[%s2027_s4] sm:$0xf] }
 0x11f   : > { %v499_v41 = vsub.f32 %v1817_v46, %v491_v18  ;;  %v498_v44 = vsub.f32 %v1815_v45, %v490_v20  ;;  %v563_v20 = vpop.permute.xlu1 %562 }
 0x120   : > { %v497_v25 = vsub.f32 %v493_v21, %v495_v22  ;;  %v496_v26 = vsub.f32 %v492_v23, %v494_v24 }
 0x122   : > { %v501_v27 = vadd.f32 1e-05, %v497_v25  ;;  %v500_v28 = vadd.f32 1e-05, %v496_v26 }
 0x124   : > { %1535 = vrsqrt.f32 %v501_v27  ;;  %vm518_vm4 = vweird.f32 %v501_v27  ;;  %vm508_vm6 = vweird.f32 %v500_v28 }
 0x125   : > { %1537 = vrsqrt.f32 %v500_v28 }
 0x12a   : > { %v1536_v29 = vpop.eup %1535 }
 0x12b   : > { %v1538_v30 = vpop.eup %1537  ;;  %v513_v31 = vmul.f32 %v1536_v29, %v501_v27  ;;  %vm519_vm2 = vweird.f32 %v1536_v29 }
 0x12c   : > { %v503_v32 = vmul.f32 %v1538_v30, %v500_v28  ;;  %vm509_vm3 = vweird.f32 %v1538_v30  ;;  %vm520_vm5 = vmor %vm518_vm4, %vm519_vm2 }
 0x12d   : > { %v514_v33 = vmul.f32 %v1536_v29, %v513_v31  ;;  %vm510_vm7 = vmor %vm508_vm6, %vm509_vm3 }
 0x12e   : > { %v504_v34 = vmul.f32 %v1538_v30, %v503_v32 }
 0x12f   : > { %v515_v35 = vmul.f32 0.5, %v514_v33 }
 0x130   : > { %v505_v37 = vmul.f32 0.5, %v504_v34 }
 0x131   : > { %v516_v38 = vsub.f32 1.5, %v515_v35 }
 0x132   : > { %v506_v39 = vsub.f32 1.5, %v505_v37 }
 0x133   : > { %v517_v40 = vmul.f32 %v1536_v29, %v516_v38 }
 0x134   : > { %v507_v42 = vmul.f32 %v1538_v30, %v506_v39 }
 0x135   : > { %v521_v43 = vsel %vm520_vm5, %v1536_v29, %v517_v40 }
 0x136   : > { %v523_v47 = vmul.f32 %v521_v43, %v499_v41  ;;  %v511_v48 = vsel %vm510_vm7, %v1538_v30, %v507_v42 }
 0x137   : > { %v522_v49 = vmul.f32 %v511_v48, %v498_v44 }
 0x138   : > { %v530_v52 = vmul.f32 %v1813_v36, %v523_v47 }
 0x139   : > { %v529_v53 = vmul.f32 %v1813_v36, %v522_v49 }
 0x13a   : > { %v537_v54 = vadd.f32 %v534_v50, %v530_v52 }
 0x13b   : > { %v536_v55 = vadd.f32 %v534_v50, %v529_v53 }
 0x13c   : > { %v541_v56 = vmul.f32 0.044715, %v537_v54  ;;  %v539_v7 = vmul.f32 0.5, %v537_v54 }
 0x13d   : > { %v540_v57 = vmul.f32 0.044715, %v536_v55  ;;  %v538_v11 = vmul.f32 0.5, %v536_v55 }
 0x13e   : > { %v543_v46 = vmul.f32 %v541_v56, %v537_v54 }
 0x13f   : > { %v542_v58 = vmul.f32 %v540_v57, %v536_v55 }
 0x140   : > { %v545_v59 = vmul.f32 %v543_v46, %v537_v54 }
 0x141   : > { %v544_v60 = vmul.f32 %v542_v58, %v536_v55 }
 0x142   : > { %v547_v61 = vadd.f32 %v545_v59, %v537_v54 }
 0x143   : > { %v546_v62 = vadd.f32 %v544_v60, %v536_v55 }
 0x144   : > { %v549_v45 = vmul.f32 0.7978846, %v547_v61 }
 0x145   : > { %v548_v63 = vmul.f32 0.7978846, %v546_v62 }
 0x146   : > { %1539 = vtanh.f32 %v549_v45 }
 0x147   : > { %1541 = vtanh.f32 %v548_v63 }
 0x14c   : > { %v1540_v0 = vpop.eup %1539 }
 0x14d   : > { %v1542_v4 = vpop.eup %1541  ;;  %v553_v8 = vadd.f32 1.0, %v1540_v0 }
 0x14e   : > { %v552_v36 = vadd.f32 1.0, %v1542_v4 }
 0x14f   : > { %v555_v13 = vmul.f32 %v553_v8, %v539_v7 }
 0x150   : > { %v554_v14 = vmul.f32 %v552_v36, %v538_v11 }
 0x151   : > { %v558_v15 = vpack.c.bf16 %v555_v13, %v555_v13 }
 0x152   : > { %v557_v16 = vpack.c.bf16 %v554_v14, %v554_v14 }
 0x153   : > { %v574_v17 = vsel %vm569_vm8, %v558_v15, 0 }
 0x154   : > { %v571_v18 = vsel %vm569_vm8, %v557_v16, 0  ;;  %596 = vmatpush.bf16.msra.mxu1 %v574_v17 }
 0x155   : > { %583 = vmatpush.bf16.msra.mxu0 %v571_v18 }
 0x157   : > { %1445 = vmatmul.msk.bf16.vlgmr.msra.gmra.mxu1 %vm565_vm9, %v556_v19 }
 0x158   : > { %1444 = vmatmul.msk.bf16.vlgmr.msra.gmra.mxu0 %vm565_vm9, %v556_v19 }
 0x1d4   : > { %v598_v21 = vpop.f32.mrf.mxu1 }
 0x1d5   : > { %v585_v22 = vpop.f32.mrf.mxu0  ;;  %v1844_v23 = vadd.f32 %v598_v21, %v563_v20 }
 0x1d6   : > { %v1846_v24 = vadd.f32 %v585_v22, %v563_v20 }
 0x1d7   : > { %v610_v25 = vrot.slane %v1844_v23, 4  ;;  %v617_v26 = vmul.f32 %v1844_v23, %v1844_v23 }
 0x1d8   : > { %v604_v27 = vrot.slane %v1846_v24, 4  ;;  %v616_v28 = vmul.f32 %v1846_v24, %v1846_v24 }
 0x1d9   : > { %v611_v29 = vadd.f32 %v610_v25, %v1844_v23  ;;  %v624_v30 = vrot.slane %v617_v26, 4 }
 0x1da   : > { %v605_v31 = vadd.f32 %v604_v27, %v1846_v24  ;;  %v618_v32 = vrot.slane %v616_v28, 4 }
 0x1db   : > { %v612_v33 = vrot.slane %v611_v29, 2  ;;  %v625_v34 = vadd.f32 %v624_v30, %v617_v26 }
 0x1dc   : > { %v606_v35 = vrot.slane %v605_v31, 2  ;;  %v619_v37 = vadd.f32 %v618_v32, %v616_v28  ;;  %v600_v38 = vpop.f32.mrf.mxu1 }
 0x1dd   : > { %v613_v39 = vadd.f32 %v612_v33, %v611_v29  ;;  %v626_v40 = vrot.slane %v625_v34, 2  ;;  %v587_v41 = vpop.f32.mrf.mxu0  ;;  %v674_v29 = vpop.permute.xlu1 %673 }
 0x1de   : > { %v607_v42 = vadd.f32 %v606_v35, %v605_v31  ;;  %v620_v43 = vrot.slane %v619_v37, 2 }
 0x1df   : > { %v614_v44 = vrot.slane %v613_v39, 1  ;;  %v627_v47 = vadd.f32 %v626_v40, %v625_v34 }
 0x1e0   : > { %v608_v48 = vrot.slane %v607_v42, 1  ;;  %v621_v49 = vadd.f32 %v620_v43, %v619_v37 }
 0x1e1   : > { %v615_v50 = vadd.f32 %v614_v44, %v613_v39  ;;  %v628_v52 = vrot.slane %v627_v47, 1 }
 0x1e2   : > { %v609_v53 = vadd.f32 %v608_v48, %v607_v42  ;;  %v622_v54 = vrot.slane %v621_v49, 1 }
 0x1e3   : > { %v629_v55 = vadd.f32 %v628_v52, %v627_v47  ;;  %v631_v56 = vmul.f32 0.125, %v615_v50 }
 0x1e4   : > { %v623_v57 = vadd.f32 %v622_v54, %v621_v49  ;;  %v630_v46 = vmul.f32 0.125, %v609_v53  ;;  %v748_v54 = vpop.permute.xlu0 %747 }
 0x1e5   : > { %v633_v58 = vmul.f32 0.125, %v629_v55  ;;  %v635_v59 = vmul.f32 %v631_v56, %v631_v56  ;;  %v639_v20 = vsub.f32 %v1844_v23, %v631_v56 }
 0x1e6   : > { %v632_v60 = vmul.f32 0.125, %v623_v57  ;;  %v634_v61 = vmul.f32 %v630_v46, %v630_v46  ;;  %v638_v21 = vsub.f32 %v1846_v24, %v630_v46 }
 0x1e7   : > { %v637_v62 = vsub.f32 %v633_v58, %v635_v59 }
 0x1e8   : > { %v636_v45 = vsub.f32 %v632_v60, %v634_v61  ;;  %v1449_v60 = vld [vmem:[%s2030_s7 + $0x8] sm:$0xff] }
 0x1e9   : > { %v641_v63 = vadd.f32 1e-05, %v637_v62  ;;  %v1448_v61 = vld [vmem:[%s2029_s6 + $0x8] sm:$0xff] }
 0x1ea   : > { %v640_v0 = vadd.f32 1e-05, %v636_v45  ;;  %v1454_v62 = vld [vmem:[%s2031_s8 + $0x8] sm:$0xff] }
 0x1eb   : > { %1543 = vrsqrt.f32 %v641_v63  ;;  %vm658_vm12 = vweird.f32 %v641_v63  ;;  %v1451_v45 = vld [vmem:[%s2028_s5 + $0x8] sm:$0xff] }
 0x1ec   : > { %1545 = vrsqrt.f32 %v640_v0  ;;  %vm648_vm13 = vweird.f32 %v640_v0 }
 0x1f1   : > { %v1544_v4 = vpop.eup %1543 }
 0x1f2   : > { %v1546_v7 = vpop.eup %1545  ;;  %v653_v8 = vmul.f32 %v1544_v4, %v641_v63  ;;  %vm659_vm10 = vweird.f32 %v1544_v4  ;;  %v1456_v63 = vld [vmem:[%s2025_s2 + $0x10] sm:$0xff] }
 0x1f3   : > { %v643_v11 = vmul.f32 %v1546_v7, %v640_v0  ;;  %vm649_vm11 = vweird.f32 %v1546_v7  ;;  %vm660_vm14 = vmor %vm658_vm12, %vm659_vm10  ;;  %v731_v0 = vpop.permute.xlu2 %730 }
 0x1f4   : > { %v654_v36 = vmul.f32 %v1544_v4, %v653_v8  ;;  %vm650_vm15 = vmor %vm648_vm13, %vm649_vm11 }
 0x1f5   : > { %v644_v13 = vmul.f32 %v1546_v7, %v643_v11 }
 0x1f6   : > { %v655_v14 = vmul.f32 0.5, %v654_v36 }
 0x1f7   : > { %v645_v15 = vmul.f32 0.5, %v644_v13 }
 0x1f8   : > { %v656_v16 = vsub.f32 1.5, %v655_v14 }
 0x1f9   : > { %v646_v17 = vsub.f32 1.5, %v645_v15 }
 0x1fa   : > { %v657_v18 = vmul.f32 %v1544_v4, %v656_v16 }
 0x1fb   : > { %v647_v19 = vmul.f32 %v1546_v7, %v646_v17 }
 0x1fc   : > { %v661_v22 = vsel %vm660_vm14, %v1544_v4, %v657_v18  ;;  %v715_v4 = vpop.permute.xlu1 %714 }
 0x1fd   : > { %v651_v25 = vsel %vm650_vm15, %v1546_v7, %v647_v19  ;;  %v663_v26 = vmul.f32 %v661_v22, %v639_v20 }
 0x1fe   : > { %v662_v27 = vmul.f32 %v651_v25, %v638_v21 }
 0x1ff   : > { %v670_v28 = vmul.f32 %v1825_v51, %v663_v26 }
 0x200   : > { %v669_v30 = vmul.f32 %v1825_v51, %v662_v27 }
 0x201   : > { %v677_v31 = vadd.f32 %v674_v29, %v670_v28 }
 0x202   : > { %v676_v32 = vadd.f32 %v674_v29, %v669_v30 }
 0x203   : > { %v681_v33 = vmul.f32 0.044715, %v677_v31  ;;  %v679_v44 = vmul.f32 0.5, %v677_v31 }
 0x204   : > { %v680_v34 = vmul.f32 0.044715, %v676_v32  ;;  %v678_v48 = vmul.f32 0.5, %v676_v32 }
 0x205   : > { %v683_v35 = vmul.f32 %v681_v33, %v677_v31 }
 0x206   : > { %v682_v37 = vmul.f32 %v680_v34, %v676_v32 }
 0x207   : > { %v685_v23 = vmul.f32 %v683_v35, %v677_v31 }
 0x208   : > { %v684_v38 = vmul.f32 %v682_v37, %v676_v32 }
 0x209   : > { %v687_v39 = vadd.f32 %v685_v23, %v677_v31 }
 0x20a   : > { %v686_v24 = vadd.f32 %v684_v38, %v676_v32 }
 0x20b   : > { %v689_v40 = vmul.f32 0.7978846, %v687_v39 }
 0x20c   : > { %v688_v41 = vmul.f32 0.7978846, %v686_v24 }
 0x20d   : > { %1547 = vtanh.f32 %v689_v40 }
 0x20e   : > { %1549 = vtanh.f32 %v688_v41 }
 0x213   : > { %v1548_v42 = vpop.eup %1547 }
 0x214   : > { %v1550_v43 = vpop.eup %1549  ;;  %v693_v47 = vadd.f32 1.0, %v1548_v42 }
 0x215   : > { %v692_v51 = vadd.f32 1.0, %v1550_v43 }
 0x216   : > { %v695_v49 = vmul.f32 %v693_v47, %v679_v44 }
 0x217   : > { %v694_v50 = vmul.f32 %v692_v51, %v678_v48 }
 0x218   : > { %v1861_v52 = vadd.f32 %v695_v49, %v1784_v12  ;;  %v1447_v12 = vld [vmem:[%s2026_s3 + $0x8] sm:$0xff] }
 0x219   : > { %v1864_v53 = vadd.f32 %v694_v50, %v1778_v6  ;;  %v752_v6 = vmul.f32 0.0, %v748_v54 }
 0x21a   : > { %v705_v55 = vmul.f32 %v1861_v52, %v1782_v9 }
 0x21b   : > { %v704_v56 = vmul.f32 %v1864_v53, %v1776_v5 }
 0x21c   : > { %v726_v57 = vmul.f32 %v1829_v10, %v705_v55  ;;  %v751_v59 = vmul.f32 %v748_v54, %v705_v55  ;;  %v718_v15 = vmul.f32 %v715_v4, %v705_v55 }
 0x21d   : > { %v750_v46 = vmul.f32 %v748_v54, %v704_v56  ;;  %v725_v58 = vmul.f32 %v1829_v10, %v704_v56  ;;  %v1455_v10 = vld [vmem:[%s2032_s9 + $0x8] sm:$0xff]  ;;  %v717_v14 = vmul.f32 %v715_v4, %v704_v56 }
 0x21e   : > { %734 = vrot.lane.b32.xlu2 %v726_v57, %s1652_s30 }
 0x21f   : > { %756 = vrot.lane.b32.xlu0 %v750_v46, %s1653_s18  ;;  %732 = vrot.lane.b32.xlu1 %v725_v58, %s1652_s30  ;;  %s1597_s30 = sshra.s32 %s1365_s11, 4  ;;  %s1598_s30 = int_to_ptr.hbm [resolvable:$true] %s1597_s30 }
 0x220   : > { %s1599_s12 = scalar_lea.hbm %s1598_s30, 16  ;;  %p1604_p0 = scmp.lt.s32.totalorder %s1598_s30, %s2033_s10 }
 0x221   : > { %p1600_p11 = scmp.ne.s32.totalorder %s1598_s30, %s1599_s12 }
 0x223   : > { %p1601_p12 = pnand %p1600_p11, %p1749_p5 }
 0x225   : > { %p1602_p13 = pneg %p1601_p12 }
 0x226   : > { %760 = vrot.lane.b32.xlu2 %v752_v6, %s1653_s18 }
 0x227   : > { %773 = vperm.xlu0 %1529, %v1447_v12   ;;  %758 = vrot.lane.b32.xlu1 %v751_v59, %s1653_s18  ;;  %s363_s18 = sand.u32 1, %s1637_s14  }
 0x228   : > { %s1440_s20 = sshll.u32 %s363_s18, 4  ;;  %s1349_s17 = scalar_lea.sflag [#allocation5], %s363_s18 }
 0x229   : > { %s365_s25 = scalar_lea.vmem [#allocation4], %s1440_s20 }
 0x22e   : > { %851 = vperm.xlu2 %1525, %v1449_v60  }
 0x22f   : > { %993 = vperm.xlu0 %1529, %v1455_v10   ;;  %844 = vperm.xlu1 %1530, %v1448_v61  }
 0x236   : > { %986 = vperm.xlu2 %1525, %v1454_v62  }
 0x237   : > { %882 = vperm.xlu1 %1530, %v1451_v45   ;;  %1532 = vset.pattern.permute.xlu0 %v1648_v2 }
 0x238   : > { %1034 = vperm.xlu0 %1532, %v1456_v63  }
 0x23e   : > { %1531 = vset.pattern.permute.xlu2 %v1649_v3 }
 0x23f   : > { %1041 = vperm.xlu1 %1530, %v1456_v63   ;;  %1067 = vperm.xlu2 %1531, %v1456_v63  }
 0x240   : > { %1534 = vset.pattern.permute.xlu0 %v1647_v1 }
 0x247   : > { %1533 = vset.pattern.permute.xlu2 %v1647_v1 }
 0x278   : > { %v735_v7 = vpop.permute.xlu2 %734 }
 0x280   : > { %v761_v2 = vpop.permute.xlu2 %760 }
 0x291   : > { %v733_v8 = vpop.permute.xlu1 %732  ;;  %v757_v11 = vpop.permute.xlu0 %756 }
 0x292   : > { %v737_v36 = vsel %vm736_vm0, %v731_v0, %v733_v8  ;;  %v738_v13 = vsel %vm736_vm0, %v733_v8, %v735_v7  ;;  %vm1056_vm0 = vcmask 72704  }
 0x293   : > { %v741_v16 = vadd.f32 %v737_v36, %v717_v14  ;;  %v742_v3 = vadd.f32 %v738_v13, %v718_v15 }
 0x299   : > { %v759_v17 = vpop.permute.xlu1 %758  ;;  %v774_v1 = vpop.permute.xlu0 %773 }
 0x29a   : > { %v763_v18 = vsel %vm762_vm1, %v757_v11, %v759_v17  ;;  %v764_v19 = vsel %vm762_vm1, %v759_v17, %v761_v2  ;;  %vm1082_vm1 = vcmask 973824  }
 0x29b   : > { %v767_v20 = vadd.f32 %v763_v18, %v741_v16  ;;  %v768_v21 = vadd.f32 %v764_v19, %v742_v3 }
 0x29d   : > { %v1899_v22 = vadd.f32 %v774_v1, %v767_v20  ;;  %v1901_v25 = vadd.f32 %v774_v1, %v768_v21 }
 0x29f   : > { %v782_v26 = vrot.slane %v1899_v22, 4  ;;  %v788_v27 = vrot.slane %v1901_v25, 4  ;;  %v794_v28 = vmul.f32 %v1899_v22, %v1899_v22  ;;  %v795_v29 = vmul.f32 %v1901_v25, %v1901_v25 }
 0x2a1   : > { %v796_v30 = vrot.slane %v794_v28, 4  ;;  %v802_v31 = vrot.slane %v795_v29, 4  ;;  %v789_v32 = vadd.f32 %v788_v27, %v1901_v25  ;;  %v1910_v33 = vpop.permute.xlu1 %844  ;;  %v783_v34 = vadd.f32 %v782_v26, %v1899_v22  ;;  %v852_v27 = vpop.permute.xlu2 %851 }
 0x2a3   : > { %v797_v35 = vadd.f32 %v796_v30, %v794_v28  ;;  %v803_v37 = vadd.f32 %v802_v31, %v795_v29  ;;  %v790_v23 = vrot.slane %v789_v32, 2  ;;  %v784_v38 = vrot.slane %v783_v34, 2 }
 0x2a5   : > { %v798_v39 = vrot.slane %v797_v35, 2  ;;  %v804_v24 = vrot.slane %v803_v37, 2  ;;  %v791_v40 = vadd.f32 %v790_v23, %v789_v32  ;;  %v785_v41 = vadd.f32 %v784_v38, %v783_v34 }
 0x2a7   : > { %v792_v42 = vrot.slane %v791_v40, 1  ;;  %v805_v43 = vadd.f32 %v804_v24, %v803_v37  ;;  %v786_v44 = vrot.slane %v785_v41, 1  ;;  %v799_v47 = vadd.f32 %v798_v39, %v797_v35 }
 0x2a9   : > { %v793_v48 = vadd.f32 %v792_v42, %v791_v40  ;;  %v806_v51 = vrot.slane %v805_v43, 1  ;;  %v787_v49 = vadd.f32 %v786_v44, %v785_v41  ;;  %v800_v50 = vrot.slane %v799_v47, 1  ;;  %v1913_v54 = vpop.permute.xlu1 %882 }
 0x2ab   : > { %v807_v55 = vadd.f32 %v806_v51, %v805_v43  ;;  %v809_v56 = vmul.f32 0.125, %v793_v48  ;;  %v801_v57 = vadd.f32 %v800_v50, %v799_v47  ;;  %v808_v46 = vmul.f32 0.125, %v787_v49 }
 0x2ad   : > { %v811_v58 = vmul.f32 0.125, %v807_v55  ;;  %v813_v6 = vmul.f32 %v809_v56, %v809_v56  ;;  %v810_v12 = vmul.f32 0.125, %v801_v57  ;;  %v812_v59 = vmul.f32 %v808_v46, %v808_v46  ;;  %v1450_v55 = vld [vmem:[%s2027_s4 + $0x4] sm:$0xf] }
 0x2ae   : > { %v817_v3 = vsub.f32 %v1901_v25, %v809_v56  ;;  %v816_v19 = vsub.f32 %v1899_v22, %v808_v46 }
 0x2af   : > { %v815_v60 = vsub.f32 %v811_v58, %v813_v6  ;;  %v814_v10 = vsub.f32 %v810_v12, %v812_v59 }
 0x2b1   : > { %v819_v61 = vadd.f32 1e-05, %v815_v60  ;;  %v1915_v62 = vpop.permute.xlu1 %1041  ;;  %v818_v45 = vadd.f32 1e-05, %v814_v10 }
 0x2b2   : > { %v1044_v63 = vmul.f32 0.0, %v1915_v62 }
 0x2b3   : > { %1551 = vrsqrt.f32 %v819_v61  ;;  %vm836_vm4 = vweird.f32 %v819_v61  ;;  %vm826_vm6 = vweird.f32 %v818_v45 }
 0x2b4   : > { %1553 = vrsqrt.f32 %v818_v45  ;;  %1050 = vrot.lane.b32.xlu1 %v1044_v63, %s1654_s26 }
 0x2b9   : > { %v1552_v0 = vpop.eup %1551 }
 0x2ba   : > { %v1554_v4 = vpop.eup %1553  ;;  %v831_v7 = vmul.f32 %v1552_v0, %v819_v61  ;;  %vm837_vm2 = vweird.f32 %v1552_v0 }
 0x2bb   : > { %v821_v8 = vmul.f32 %v1554_v4, %v818_v45  ;;  %vm827_vm3 = vweird.f32 %v1554_v4  ;;  %vm838_vm5 = vmor %vm836_vm4, %vm837_vm2 }
 0x2bc   : > { %v832_v11 = vmul.f32 %v1552_v0, %v831_v7  ;;  %vm828_vm7 = vmor %vm826_vm6, %vm827_vm3 }
 0x2bd   : > { %v822_v36 = vmul.f32 %v1554_v4, %v821_v8 }
 0x2be   : > { %v833_v13 = vmul.f32 0.5, %v832_v11 }
 0x2bf   : > { %v823_v14 = vmul.f32 0.5, %v822_v36 }
 0x2c0   : > { %v834_v15 = vsub.f32 1.5, %v833_v13 }
 0x2c1   : > { %v824_v2 = vsub.f32 1.5, %v823_v14 }
 0x2c2   : > { %v835_v16 = vmul.f32 %v1552_v0, %v834_v15 }
 0x2c3   : > { %v825_v17 = vmul.f32 %v1554_v4, %v824_v2 }
 0x2c4   : > { %v839_v18 = vsel %vm838_vm5, %v1552_v0, %v835_v16 }
 0x2c5   : > { %v841_v20 = vmul.f32 %v839_v18, %v817_v3  ;;  %v829_v21 = vsel %vm828_vm7, %v1554_v4, %v825_v17 }
 0x2c6   : > { %v840_v1 = vmul.f32 %v829_v21, %v816_v19 }
 0x2c7   : > { %v848_v26 = vmul.f32 %v1910_v33, %v841_v20 }
 0x2c8   : > { %v847_v28 = vmul.f32 %v1910_v33, %v840_v1 }
 0x2c9   : > { %v855_v29 = vadd.f32 %v852_v27, %v848_v26 }
 0x2ca   : > { %v854_v30 = vadd.f32 %v852_v27, %v847_v28 }
 0x2cb   : > { %v859_v31 = vmul.f32 0.044715, %v855_v29  ;;  %v857_v41 = vmul.f32 0.5, %v855_v29 }
 0x2cc   : > { %v858_v32 = vmul.f32 0.044715, %v854_v30  ;;  %v856_v43 = vmul.f32 0.5, %v854_v30 }
 0x2cd   : > { %v861_v25 = vmul.f32 %v859_v31, %v855_v29 }
 0x2ce   : > { %v860_v34 = vmul.f32 %v858_v32, %v854_v30 }
 0x2cf   : > { %v863_v35 = vmul.f32 %v861_v25, %v855_v29 }
 0x2d0   : > { %v862_v37 = vmul.f32 %v860_v34, %v854_v30 }
 0x2d1   : > { %v865_v23 = vadd.f32 %v863_v35, %v855_v29 }
 0x2d2   : > { %v864_v38 = vadd.f32 %v862_v37, %v854_v30 }
 0x2d3   : > { %v867_v22 = vmul.f32 0.7978846, %v865_v23 }
 0x2d4   : > { %v866_v39 = vmul.f32 0.7978846, %v864_v38 }
 0x2d5   : > { %1555 = vtanh.f32 %v867_v22 }
 0x2d6   : > { %1557 = vtanh.f32 %v866_v39 }
 0x2db   : > { %v1556_v24 = vpop.eup %1555 }
 0x2dc   : > { %v1558_v40 = vpop.eup %1557  ;;  %v871_v42 = vadd.f32 1.0, %v1556_v24 }
 0x2dd   : > { %v870_v33 = vadd.f32 1.0, %v1558_v40 }
 0x2de   : > { %v873_v44 = vmul.f32 %v871_v42, %v857_v41 }
 0x2df   : > { %v872_v47 = vmul.f32 %v870_v33, %v856_v43 }
 0x2e0   : > { %v877_v48 = vpack.c.bf16 %v873_v44, %v873_v44 }
 0x2e1   : > { %v876_v51 = vpack.c.bf16 %v872_v47, %v872_v47 }
 0x2e2   : > { %v892_v49 = vsel %vm569_vm8, %v877_v48, 0 }
 0x2e3   : > { %v889_v50 = vsel %vm569_vm8, %v876_v51, 0  ;;  %914 = vmatpush.bf16.msra.mxu3 %v892_v49 }
 0x2e4   : > { %901 = vmatpush.bf16.msra.mxu2 %v889_v50 }
 0x2e6   : > { %1453 = vmatmul.msk.bf16.vlgmr.msra.gmra.mxu3 %vm565_vm9, %v1450_v55 }
 0x2e7   : > { %1452 = vmatmul.msk.bf16.vlgmr.msra.gmra.mxu2 %vm565_vm9, %v1450_v55 }
 0x369   : > { %v916_v56 = vpop.f32.mrf.mxu3 }
 0x36a   : > { %v903_v57 = vpop.f32.mrf.mxu2  ;;  %v1931_v46 = vadd.f32 %v916_v56, %v1913_v54  ;;  %v987_v56 = vpop.permute.xlu2 %986 }
 0x36b   : > { %v1934_v58 = vadd.f32 %v903_v57, %v1913_v54 }
 0x36c   : > { %v930_v6 = vrot.slane %v1931_v46, 4  ;;  %v937_v12 = vmul.f32 %v1931_v46, %v1931_v46 }
 0x36d   : > { %v924_v59 = vrot.slane %v1934_v58, 4  ;;  %v936_v60 = vmul.f32 %v1934_v58, %v1934_v58 }
 0x36e   : > { %v931_v10 = vadd.f32 %v930_v6, %v1931_v46  ;;  %v944_v61 = vrot.slane %v937_v12, 4 }
 0x36f   : > { %v925_v45 = vadd.f32 %v924_v59, %v1934_v58  ;;  %v938_v63 = vrot.slane %v936_v60, 4 }
 0x370   : > { %v932_v0 = vrot.slane %v931_v10, 2  ;;  %v945_v4 = vadd.f32 %v944_v61, %v937_v12  ;;  %v994_v12 = vpop.permute.xlu0 %993 }
 0x371   : > { %v926_v54 = vrot.slane %v925_v45, 2  ;;  %v939_v7 = vadd.f32 %v938_v63, %v936_v60  ;;  %v918_v8 = vpop.f32.mrf.mxu3 }
 0x372   : > { %v933_v11 = vadd.f32 %v932_v0, %v931_v10  ;;  %v946_v36 = vrot.slane %v945_v4, 2  ;;  %v905_v13 = vpop.f32.mrf.mxu2 }
 0x373   : > { %v927_v14 = vadd.f32 %v926_v54, %v925_v45  ;;  %v940_v15 = vrot.slane %v939_v7, 2 }
 0x374   : > { %v934_v2 = vrot.slane %v933_v11, 1  ;;  %v947_v16 = vadd.f32 %v946_v36, %v945_v4 }
 0x375   : > { %v928_v3 = vrot.slane %v927_v14, 1  ;;  %v941_v17 = vadd.f32 %v940_v15, %v939_v7 }
 0x376   : > { %v935_v18 = vadd.f32 %v934_v2, %v933_v11  ;;  %v948_v19 = vrot.slane %v947_v16, 1 }
 0x377   : > { %v929_v20 = vadd.f32 %v928_v3, %v927_v14  ;;  %v942_v21 = vrot.slane %v941_v17, 1 }
 0x378   : > { %v949_v1 = vadd.f32 %v948_v19, %v947_v16  ;;  %v951_v26 = vmul.f32 0.125, %v935_v18  ;;  %v1068_v18 = vpop.permute.xlu2 %1067 }
 0x379   : > { %v943_v27 = vadd.f32 %v942_v21, %v941_v17  ;;  %v950_v28 = vmul.f32 0.125, %v929_v20 }
 0x37a   : > { %v953_v29 = vmul.f32 0.125, %v949_v1  ;;  %v955_v30 = vmul.f32 %v951_v26, %v951_v26  ;;  %v959_v48 = vsub.f32 %v1931_v46, %v951_v26 }
 0x37b   : > { %v952_v31 = vmul.f32 0.125, %v943_v27  ;;  %v954_v32 = vmul.f32 %v950_v28, %v950_v28  ;;  %v958_v51 = vsub.f32 %v1934_v58, %v950_v28 }
 0x37c   : > { %v957_v25 = vsub.f32 %v953_v29, %v955_v30  ;;  %v1459_v29 = vld [vmem:[%s2030_s7 + $0x10] sm:$0xff] }
 0x37d   : > { %v956_v34 = vsub.f32 %v952_v31, %v954_v32  ;;  %v1464_v30 = vld [vmem:[%s2031_s8 + $0x10] sm:$0xff] }
 0x37e   : > { %v961_v35 = vadd.f32 1e-05, %v957_v25  ;;  %v1461_v31 = vld [vmem:[%s2028_s5 + $0x10] sm:$0xff] }
 0x37f   : > { %v960_v37 = vadd.f32 1e-05, %v956_v34  ;;  %v1465_v32 = vld [vmem:[%s2032_s9 + $0x10] sm:$0xff]  ;;  %v1051_v34 = vpop.permute.xlu1 %1050 }
 0x380   : > { %1559 = vrsqrt.f32 %v961_v35  ;;  %vm978_vm12 = vweird.f32 %v961_v35 }
 0x381   : > { %1561 = vrsqrt.f32 %v960_v37  ;;  %vm968_vm13 = vweird.f32 %v960_v37 }
 0x386   : > { %v1560_v23 = vpop.eup %1559 }
 0x387   : > { %v1562_v38 = vpop.eup %1561  ;;  %v973_v22 = vmul.f32 %v1560_v23, %v961_v35  ;;  %vm979_vm10 = vweird.f32 %v1560_v23  ;;  %v1035_v35 = vpop.permute.xlu0 %1034 }
 0x388   : > { %v963_v39 = vmul.f32 %v1562_v38, %v960_v37  ;;  %vm969_vm11 = vweird.f32 %v1562_v38  ;;  %vm980_vm14 = vmor %vm978_vm12, %vm979_vm10 }
 0x389   : > { %v974_v24 = vmul.f32 %v1560_v23, %v973_v22  ;;  %vm970_vm15 = vmor %vm968_vm13, %vm969_vm11 }
 0x38a   : > { %v964_v40 = vmul.f32 %v1562_v38, %v963_v39 }
 0x38b   : > { %v975_v41 = vmul.f32 0.5, %v974_v24 }
 0x38c   : > { %v965_v42 = vmul.f32 0.5, %v964_v40 }
 0x38d   : > { %v976_v43 = vsub.f32 1.5, %v975_v41 }
 0x38e   : > { %v966_v33 = vsub.f32 1.5, %v965_v42 }
 0x38f   : > { %v977_v44 = vmul.f32 %v1560_v23, %v976_v43 }
 0x390   : > { %v967_v47 = vmul.f32 %v1562_v38, %v966_v33 }
 0x391   : > { %v981_v49 = vsel %vm980_vm14, %v1560_v23, %v977_v44 }
 0x392   : > { %v971_v50 = vsel %vm970_vm15, %v1562_v38, %v967_v47  ;;  %v983_v55 = vmul.f32 %v981_v49, %v959_v48 }
 0x393   : > { %v982_v57 = vmul.f32 %v971_v50, %v958_v51 }
 0x394   : > { %v990_v6 = vmul.f32 %v987_v56, %v983_v55 }
 0x395   : > { %v989_v59 = vmul.f32 %v987_v56, %v982_v57 }
 0x396   : > { %v997_v60 = vadd.f32 %v994_v12, %v990_v6 }
 0x397   : > { %v996_v10 = vadd.f32 %v994_v12, %v989_v59 }
 0x398   : > { %v1001_v61 = vmul.f32 0.044715, %v997_v60  ;;  %v999_v13 = vmul.f32 0.5, %v997_v60 }
 0x399   : > { %v1000_v45 = vmul.f32 0.044715, %v996_v10  ;;  %v998_v15 = vmul.f32 0.5, %v996_v10 }
 0x39a   : > { %v1003_v63 = vmul.f32 %v1001_v61, %v997_v60 }
 0x39b   : > { %v1002_v0 = vmul.f32 %v1000_v45, %v996_v10 }
 0x39c   : > { %v1005_v4 = vmul.f32 %v1003_v63, %v997_v60 }
 0x39d   : > { %v1004_v46 = vmul.f32 %v1002_v0, %v996_v10 }
 0x39e   : > { %v1007_v54 = vadd.f32 %v1005_v4, %v997_v60 }
 0x39f   : > { %v1006_v7 = vadd.f32 %v1004_v46, %v996_v10 }
 0x3a0   : > { %v1009_v58 = vmul.f32 0.7978846, %v1007_v54 }
 0x3a1   : > { %v1008_v8 = vmul.f32 0.7978846, %v1006_v7 }
 0x3a2   : > { %1563 = vtanh.f32 %v1009_v58 }
 0x3a3   : > { %1565 = vtanh.f32 %v1008_v8 }
 0x3a8   : > { %v1564_v11 = vpop.eup %1563 }
 0x3a9   : > { %v1566_v36 = vpop.eup %1565  ;;  %v1013_v14 = vadd.f32 1.0, %v1564_v11 }
 0x3aa   : > { %v1012_v2 = vadd.f32 1.0, %v1566_v36 }
 0x3ab   : > { %v1015_v16 = vmul.f32 %v1013_v14, %v999_v13 }
 0x3ac   : > { %v1014_v3 = vmul.f32 %v1012_v2, %v998_v15 }
 0x3ad   : > { %v1947_v17 = vadd.f32 %v1015_v16, %v1861_v52  ;;  %v1072_v52 = vmul.f32 0.0, %v1068_v18 }
 0x3ae   : > { %v1950_v19 = vadd.f32 %v1014_v3, %v1864_v53  ;;  %v1458_v53 = vld [vmem:[%s2029_s6 + $0x10] sm:$0xff] }
 0x3af   : > { %v1025_v20 = vmul.f32 %v1947_v17, %v1782_v9 }
 0x3b0   : > { %v1024_v21 = vmul.f32 %v1950_v19, %v1776_v5 }
 0x3b1   : > { %v1071_v1 = vmul.f32 %v1068_v18, %v1025_v20  ;;  %v1046_v26 = vmul.f32 %v1915_v62, %v1025_v20  ;;  %v1038_v44 = vmul.f32 %v1035_v35, %v1025_v20 }
 0x3b2   : > { %v1045_v27 = vmul.f32 %v1915_v62, %v1024_v21  ;;  %v1070_v28 = vmul.f32 %v1068_v18, %v1024_v21  ;;  %v1457_v62 = vld [vmem:[%s2026_s3 + $0x10] sm:$0xff]  ;;  %v1037_v38 = vmul.f32 %v1035_v35, %v1024_v21 }
 0x3b3   : > { %1078 = vrot.lane.b32.xlu0 %v1071_v1, %s1655_s29  ;;  %1054 = vrot.lane.b32.xlu1 %v1046_v26, %s1654_s26 }
 0x3b4   : > { %1052 = vrot.lane.b32.xlu2 %v1045_v27, %s1654_s26  ;;  %s1603_s26 = scalar_lea.hbm %s2033_s10, 32 }
 0x3b5   : > { %p1605_p1 = scmp.lt.s32.totalorder %s1603_s26, %s1599_s12 }
 0x3b7   : > { %p1606_p2 = por %p1605_p1, %p1604_p0 }
 0x3b9   : > { %p1607_p3 = pnand %p1606_p2, %p1602_p13 }
 0x3bb   : > { %1080 = vrot.lane.b32.xlu1 %v1072_v52, %s1655_s29  ;;  %1164 = vperm.xlu0 %1534, %v1458_v53  }
 0x3bc   : > { %1076 = vrot.lane.b32.xlu2 %v1070_v28, %s1655_s29  ;;  %s1362_s29 = sshll.u32 %s365_s25, 4  ;;  %s1363_s29 = int_to_ptr.vmem [resolvable:$true] %s1362_s29 }
 0x3c3   : > { %1171 = vperm.xlu1 %1530, %v1459_v29  }
 0x3c4   : > { %1093 = vperm.xlu2 %1533, %v1457_v62  }
 0x3cb   : > { %1306 = vperm.xlu1 %1530, %v1464_v30  }
 0x3cc   : > { %1202 = vperm.xlu2 %1533, %v1461_v31  }
 0x3d4   : > { %1313 = vperm.xlu2 %1533, %v1465_v32  }
 0x40e   : > { %v1053_v25 = vpop.permute.xlu2 %1052 }
 0x40f   : > { %v1057_v23 = vsel %vm1056_vm0, %v1051_v34, %v1053_v25 }
 0x410   : > { %v1061_v22 = vadd.f32 %v1057_v23, %v1037_v38 }
 0x416   : > { %v1077_v37 = vpop.permute.xlu2 %1076 }
 0x41e   : > { %v1094_v42 = vpop.permute.xlu2 %1093 }
 0x425   : > { %v1079_v39 = vpop.permute.xlu0 %1078  ;;  %v1055_v24 = vpop.permute.xlu1 %1054 }
 0x426   : > { %v1083_v40 = vsel %vm1082_vm1, %v1077_v37, %v1079_v39  ;;  %v1058_v33 = vsel %vm1056_vm0, %v1053_v25, %v1055_v24 }
 0x427   : > { %v1087_v41 = vadd.f32 %v1083_v40, %v1061_v22  ;;  %v1062_v49 = vadd.f32 %v1058_v33, %v1038_v44 }
 0x429   : > { %v1096_v43 = vadd.f32 %v1094_v42, %v1087_v41 }
 0x42b   : > { %v1102_v47 = vrot.slane %v1096_v43, 4  ;;  %v1114_v48 = vmul.f32 %v1096_v43, %v1096_v43 }
 0x42d   : > { %v1116_v51 = vrot.slane %v1114_v48, 4  ;;  %v1081_v50 = vpop.permute.xlu1 %1080  ;;  %v1103_v55 = vadd.f32 %v1102_v47, %v1096_v43  ;;  %v1165_v38 = vpop.permute.xlu0 %1164 }
 0x42e   : > { %v1084_v56 = vsel %vm1082_vm1, %v1079_v39, %v1081_v50 }
 0x42f   : > { %v1117_v57 = vadd.f32 %v1116_v51, %v1114_v48  ;;  %v1088_v6 = vadd.f32 %v1084_v56, %v1062_v49  ;;  %v1104_v12 = vrot.slane %v1103_v55, 2 }
 0x431   : > { %v1118_v59 = vrot.slane %v1117_v57, 2  ;;  %v1097_v60 = vadd.f32 %v1094_v42, %v1088_v6  ;;  %v1105_v10 = vadd.f32 %v1104_v12, %v1103_v55 }
 0x433   : > { %v1108_v61 = vrot.slane %v1097_v60, 4  ;;  %v1115_v45 = vmul.f32 %v1097_v60, %v1097_v60  ;;  %v1106_v63 = vrot.slane %v1105_v10, 1  ;;  %v1119_v0 = vadd.f32 %v1118_v59, %v1117_v57 }
 0x435   : > { %v1122_v4 = vrot.slane %v1115_v45, 4  ;;  %v1107_v46 = vadd.f32 %v1106_v63, %v1105_v10  ;;  %v1109_v54 = vadd.f32 %v1108_v61, %v1097_v60  ;;  %v1120_v7 = vrot.slane %v1119_v0, 1  ;;  %v1172_v42 = vpop.permute.xlu1 %1171 }
 0x437   : > { %v1123_v58 = vadd.f32 %v1122_v4, %v1115_v45  ;;  %v1110_v8 = vrot.slane %v1109_v54, 2  ;;  %v1121_v11 = vadd.f32 %v1120_v7, %v1119_v0  ;;  %v1128_v36 = vmul.f32 0.125, %v1107_v46 }
 0x439   : > { %v1124_v13 = vrot.slane %v1123_v58, 2  ;;  %v1111_v14 = vadd.f32 %v1110_v8, %v1109_v54  ;;  %v1130_v15 = vmul.f32 0.125, %v1121_v11  ;;  %v1132_v2 = vmul.f32 %v1128_v36, %v1128_v36  ;;  %v1460_v8 = vld [vmem:[%s2027_s4 + $0x8] sm:$0xf] }
 0x43a   : > { %v1136_v23 = vsub.f32 %v1096_v43, %v1128_v36 }
 0x43b   : > { %v1112_v16 = vrot.slane %v1111_v14, 1  ;;  %v1125_v3 = vadd.f32 %v1124_v13, %v1123_v58  ;;  %v1134_v18 = vsub.f32 %v1130_v15, %v1132_v2  ;;  %v1203_v2 = vpop.permute.xlu2 %1202 }
 0x43d   : > { %v1113_v20 = vadd.f32 %v1112_v16, %v1111_v14  ;;  %v1126_v21 = vrot.slane %v1125_v3, 1  ;;  %v1138_v1 = vadd.f32 1e-05, %v1134_v18 }
 0x43f   : > { %v1127_v26 = vadd.f32 %v1126_v21, %v1125_v3  ;;  %v1129_v27 = vmul.f32 0.125, %v1113_v20  ;;  %1567 = vrsqrt.f32 %v1138_v1  ;;  %vm1146_vm3 = vweird.f32 %v1138_v1 }
 0x441   : > { %v1131_v52 = vmul.f32 0.125, %v1127_v26  ;;  %v1133_v53 = vmul.f32 %v1129_v27, %v1129_v27  ;;  %v1137_v48 = vsub.f32 %v1097_v60, %v1129_v27 }
 0x443   : > { %v1135_v28 = vsub.f32 %v1131_v52, %v1133_v53 }
 0x445   : > { %v1568_v29 = vpop.eup %1567  ;;  %v1139_v62 = vadd.f32 1e-05, %v1135_v28 }
 0x446   : > { %v1141_v30 = vmul.f32 %v1568_v29, %v1138_v1  ;;  %vm1147_vm2 = vweird.f32 %v1568_v29 }
 0x447   : > { %1569 = vrsqrt.f32 %v1139_v62  ;;  %vm1148_vm4 = vmor %vm1146_vm3, %vm1147_vm2  ;;  %vm1156_vm6 = vweird.f32 %v1139_v62 }
 0x448   : > { %v1142_v31 = vmul.f32 %v1568_v29, %v1141_v30 }
 0x44a   : > { %v1143_v32 = vmul.f32 0.5, %v1142_v31 }
 0x44c   : > { %v1144_v25 = vsub.f32 1.5, %v1143_v32 }
 0x44d   : > { %v1570_v34 = vpop.eup %1569 }
 0x44e   : > { %v1145_v35 = vmul.f32 %v1568_v29, %v1144_v25  ;;  %v1151_v37 = vmul.f32 %v1570_v34, %v1139_v62  ;;  %vm1157_vm5 = vweird.f32 %v1570_v34 }
 0x44f   : > { %vm1158_vm7 = vmor %vm1156_vm6, %vm1157_vm5 }
 0x450   : > { %v1149_v22 = vsel %vm1148_vm4, %v1568_v29, %v1145_v35  ;;  %v1152_v39 = vmul.f32 %v1570_v34, %v1151_v37 }
 0x451   : > { %v1160_v24 = vmul.f32 %v1149_v22, %v1136_v23 }
 0x452   : > { %v1153_v40 = vmul.f32 0.5, %v1152_v39 }
 0x453   : > { %v1167_v41 = vmul.f32 %v1165_v38, %v1160_v24 }
 0x454   : > { %v1154_v33 = vsub.f32 1.5, %v1153_v40 }
 0x455   : > { %v1174_v44 = vadd.f32 %v1172_v42, %v1167_v41 }
 0x456   : > { %v1155_v47 = vmul.f32 %v1570_v34, %v1154_v33 }
 0x457   : > { %v1178_v51 = vmul.f32 0.044715, %v1174_v44  ;;  %v1176_v4 = vmul.f32 0.5, %v1174_v44 }
 0x458   : > { %v1159_v49 = vsel %vm1158_vm7, %v1570_v34, %v1155_v47 }
 0x459   : > { %v1161_v50 = vmul.f32 %v1159_v49, %v1137_v48  ;;  %v1180_v55 = vmul.f32 %v1178_v51, %v1174_v44 }
 0x45b   : > { %v1168_v43 = vmul.f32 %v1165_v38, %v1161_v50  ;;  %v1182_v56 = vmul.f32 %v1180_v55, %v1174_v44 }
 0x45d   : > { %v1175_v57 = vadd.f32 %v1172_v42, %v1168_v43  ;;  %v1184_v6 = vadd.f32 %v1182_v56, %v1174_v44 }
 0x45f   : > { %v1186_v12 = vmul.f32 0.7978846, %v1184_v6  ;;  %v1179_v59 = vmul.f32 0.044715, %v1175_v57  ;;  %v1177_v11 = vmul.f32 0.5, %v1175_v57 }
 0x461   : > { %1571 = vtanh.f32 %v1186_v12  ;;  %v1181_v10 = vmul.f32 %v1179_v59, %v1175_v57 }
 0x463   : > { %v1183_v61 = vmul.f32 %v1181_v10, %v1175_v57 }
 0x465   : > { %v1185_v45 = vadd.f32 %v1183_v61, %v1175_v57 }
 0x467   : > { %v1572_v63 = vpop.eup %1571  ;;  %v1187_v0 = vmul.f32 0.7978846, %v1185_v45 }
 0x468   : > { %v1190_v46 = vadd.f32 1.0, %v1572_v63 }
 0x469   : > { %1573 = vtanh.f32 %v1187_v0 }
 0x46a   : > { %v1192_v60 = vmul.f32 %v1190_v46, %v1176_v4 }
 0x46c   : > { %v1196_v54 = vpack.c.bf16 %v1192_v60, %v1192_v60 }
 0x46e   : > { %v1209_v7 = vsel %vm569_vm8, %v1196_v54, 0 }
 0x46f   : > { %v1574_v58 = vpop.eup %1573  ;;  %1221 = vmatpush.bf16.msrb.mxu0 %v1209_v7 }
 0x470   : > { %v1191_v36 = vadd.f32 1.0, %v1574_v58 }
 0x472   : > { %1462 = vmatmul.msk.bf16.vlgmr.msrb.gmra.mxu0 %vm565_vm9, %v1460_v8  ;;  %v1193_v13 = vmul.f32 %v1191_v36, %v1177_v11  ;;  %v1307_v11 = vpop.permute.xlu1 %1306 }
 0x474   : > { %v1197_v14 = vpack.c.bf16 %v1193_v13, %v1193_v13 }
 0x476   : > { %v1212_v15 = vsel %vm569_vm8, %v1197_v14, 0  ;;  %v1314_v14 = vpop.permute.xlu2 %1313 }
 0x477   : > { %1234 = vmatpush.bf16.msrb.mxu1 %v1212_v15 }
 0x47a   : > { %1463 = vmatmul.msk.bf16.vlgmr.msrb.gmra.mxu1 %vm565_vm9, %v1460_v8 }
 0x4ef   : > { %v1223_v16 = vpop.f32.mrf.mxu0 }
 0x4f0   : > { %v1224_v3 = vadd.f32 %v1223_v16, %v1203_v2 }
 0x4f2   : > { %v1244_v18 = vrot.slane %v1224_v3, 4  ;;  %v1256_v20 = vmul.f32 %v1224_v3, %v1224_v3 }
 0x4f4   : > { %v1245_v21 = vadd.f32 %v1244_v18, %v1224_v3  ;;  %v1258_v1 = vrot.slane %v1256_v20, 4 }
 0x4f6   : > { %v1246_v26 = vrot.slane %v1245_v21, 2  ;;  %v1259_v27 = vadd.f32 %v1258_v1, %v1256_v20 }
 0x4f7   : > { %v1236_v52 = vpop.f32.mrf.mxu1  ;;  %v1225_v53 = vpop.f32.mrf.mxu0 }
 0x4f8   : > { %v1247_v28 = vadd.f32 %v1246_v26, %v1245_v21  ;;  %v1260_v29 = vrot.slane %v1259_v27, 2  ;;  %v1237_v62 = vadd.f32 %v1236_v52, %v1203_v2 }
 0x4fa   : > { %v1248_v30 = vrot.slane %v1247_v28, 1  ;;  %v1261_v31 = vadd.f32 %v1260_v29, %v1259_v27  ;;  %v1250_v32 = vrot.slane %v1237_v62, 4  ;;  %v1257_v25 = vmul.f32 %v1237_v62, %v1237_v62 }
 0x4fc   : > { %v1249_v34 = vadd.f32 %v1248_v30, %v1247_v28  ;;  %v1262_v35 = vrot.slane %v1261_v31, 1  ;;  %v1251_v37 = vadd.f32 %v1250_v32, %v1237_v62  ;;  %v1264_v23 = vrot.slane %v1257_v25, 4 }
 0x4fe   : > { %v1263_v38 = vadd.f32 %v1262_v35, %v1261_v31  ;;  %v1270_v22 = vmul.f32 0.125, %v1249_v34  ;;  %v1252_v39 = vrot.slane %v1251_v37, 2  ;;  %v1265_v24 = vadd.f32 %v1264_v23, %v1257_v25 }
 0x4ff   : > { %v1238_v40 = vpop.f32.mrf.mxu1 }
 0x500   : > { %v1272_v41 = vmul.f32 0.125, %v1263_v38  ;;  %v1274_v42 = vmul.f32 %v1270_v22, %v1270_v22  ;;  %v1253_v33 = vadd.f32 %v1252_v39, %v1251_v37  ;;  %v1266_v44 = vrot.slane %v1265_v24, 2 }
 0x501   : > { %v1278_v60 = vsub.f32 %v1224_v3, %v1270_v22 }
 0x502   : > { %v1276_v47 = vsub.f32 %v1272_v41, %v1274_v42  ;;  %v1254_v48 = vrot.slane %v1253_v33, 1  ;;  %v1267_v51 = vadd.f32 %v1266_v44, %v1265_v24 }
 0x504   : > { %v1280_v49 = vadd.f32 1e-05, %v1276_v47  ;;  %v1255_v50 = vadd.f32 %v1254_v48, %v1253_v33  ;;  %v1268_v55 = vrot.slane %v1267_v51, 1 }
 0x506   : > { %1575 = vrsqrt.f32 %v1280_v49  ;;  %v1271_v43 = vmul.f32 0.125, %v1255_v50  ;;  %v1269_v56 = vadd.f32 %v1268_v55, %v1267_v51  ;;  %vm1288_vm9 = vweird.f32 %v1280_v49 }
 0x508   : > { %v1275_v57 = vmul.f32 %v1271_v43, %v1271_v43  ;;  %v1273_v6 = vmul.f32 0.125, %v1269_v56  ;;  %v1279_v20 = vsub.f32 %v1237_v62, %v1271_v43 }
 0x50a   : > { %v1277_v12 = vsub.f32 %v1273_v6, %v1275_v57 }
 0x50c   : > { %v1576_v59 = vpop.eup %1575  ;;  %v1281_v61 = vadd.f32 1e-05, %v1277_v12 }
 0x50d   : > { %v1283_v10 = vmul.f32 %v1576_v59, %v1280_v49  ;;  %vm1289_vm8 = vweird.f32 %v1576_v59 }
 0x50e   : > { %1577 = vrsqrt.f32 %v1281_v61  ;;  %vm1290_vm10 = vmor %vm1288_vm9, %vm1289_vm8  ;;  %vm1298_vm12 = vweird.f32 %v1281_v61 }
 0x50f   : > { %v1284_v45 = vmul.f32 %v1576_v59, %v1283_v10 }
 0x511   : > { %v1285_v63 = vmul.f32 0.5, %v1284_v45 }
 0x513   : > { %v1286_v0 = vsub.f32 1.5, %v1285_v63 }
 0x514   : > { %v1578_v4 = vpop.eup %1577 }
 0x515   : > { %v1287_v46 = vmul.f32 %v1576_v59, %v1286_v0  ;;  %v1293_v54 = vmul.f32 %v1578_v4, %v1281_v61  ;;  %vm1299_vm11 = vweird.f32 %v1578_v4 }
 0x516   : > { %vm1300_vm13 = vmor %vm1298_vm12, %vm1299_vm11 }
 0x517   : > { %v1291_v7 = vsel %vm1290_vm10, %v1576_v59, %v1287_v46  ;;  %v1294_v8 = vmul.f32 %v1578_v4, %v1293_v54 }
 0x518   : > { %v1302_v58 = vmul.f32 %v1291_v7, %v1278_v60 }
 0x519   : > { %v1295_v13 = vmul.f32 0.5, %v1294_v8 }
 0x51a   : > { %v1309_v36 = vmul.f32 %v1307_v11, %v1302_v58 }
 0x51b   : > { %v1296_v2 = vsub.f32 1.5, %v1295_v13 }
 0x51c   : > { %v1316_v15 = vadd.f32 %v1314_v14, %v1309_v36 }
 0x51d   : > { %v1297_v16 = vmul.f32 %v1578_v4, %v1296_v2 }
 0x51e   : > { %v1320_v18 = vmul.f32 0.044715, %v1316_v15  ;;  %v1318_v34 = vmul.f32 0.5, %v1316_v15 }
 0x51f   : > { %v1301_v21 = vsel %vm1300_vm13, %v1578_v4, %v1297_v16 }
 0x520   : > { %v1322_v3 = vmul.f32 %v1320_v18, %v1316_v15  ;;  %v1303_v1 = vmul.f32 %v1301_v21, %v1279_v20 }
 0x522   : > { %v1324_v26 = vmul.f32 %v1322_v3, %v1316_v15  ;;  %v1310_v27 = vmul.f32 %v1307_v11, %v1303_v1 }
 0x524   : > { %v1326_v52 = vadd.f32 %v1324_v26, %v1316_v15  ;;  %v1317_v53 = vadd.f32 %v1314_v14, %v1310_v27 }
 0x526   : > { %v1328_v28 = vmul.f32 0.7978846, %v1326_v52  ;;  %v1321_v29 = vmul.f32 0.044715, %v1317_v53  ;;  %v1319_v39 = vmul.f32 0.5, %v1317_v53 }
 0x528   : > { %1579 = vtanh.f32 %v1328_v28  ;;  %v1323_v30 = vmul.f32 %v1321_v29, %v1317_v53 }
 0x52a   : > { %v1325_v31 = vmul.f32 %v1323_v30, %v1317_v53 }
 0x52c   : > { %v1327_v32 = vadd.f32 %v1325_v31, %v1317_v53 }
 0x52e   : > { %v1580_v25 = vpop.eup %1579  ;;  %v1329_v62 = vmul.f32 0.7978846, %v1327_v32 }
 0x52f   : > { %v1332_v35 = vadd.f32 1.0, %v1580_v25 }
 0x530   : > { %1581 = vtanh.f32 %v1329_v62 }
 0x531   : > { %v1334_v37 = vmul.f32 %v1332_v35, %v1318_v34 }
 0x533   : > { %v1338_v23 = vadd.f32 %v1334_v37, %v1950_v19 }
 0x535   : > { %v1344_v38 = vmul.f32 %v1338_v23, %v1776_v5 }
 0x536   : > { %v1582_v22 = vpop.eup %1581 }
 0x537   : > { %1346 = vst [vmem:[%s365_s25] sm:$0xff] %v1344_v38  ;;  %v1333_v24 = vadd.f32 1.0, %v1582_v22 }
 0x539   : > { %v1335_v40 = vmul.f32 %v1333_v24, %v1319_v39 }
 0x53b   : > { %v1339_v41 = vadd.f32 %v1335_v40, %v1947_v17 }
 0x53d   : > { %v1345_v19 = vmul.f32 %v1339_v41, %v1782_v9 }
 0x53f   : > { %1347 = vst [vmem:[%s365_s25 + $0x8] sm:$0xff] %v1345_v19 }
 0x540   : > { %1610 = shalt.err (!%p1607_p3)
}
 0x541   : > { %1473 = dma.vmem_to_hbm [thread:$0]  (%p1749_p5), %s1363_s29, 256, %s1365_s11, %s1349_s17  }
 0x542 PF: > { %p1479_p4 = scmp.ge.s32.totalorder %s1645_s16, 2  ;;  %s1376_s18 = sand.u32 1, %s1633_s13  }
 0x543   : > { %s1377_s25 = scalar_lea.sflag [#allocation5], %s1376_s18 }
 0x544   : > { %p1476_p7 = pnand %p1479_p4, %p1753_p6 }
 0x546   : > { %p1477_p8 = pneg %p1476_p7 }
 0x548   : > { %1628 = dma.done.wait (%p1477_p8), %s1377_s25, 256  }
 0x549   : > { %1630 = vsyncadd (%p1477_p8), %s1377_s25, 4294967040  ;;  %p20_p9 = scmp.ge.s32.totalorder %s1736_s19, 4   ;;  %s2036_s13 = smov %s1637_s14 }
 0x54a   : > { %s2037_s14 = smov %s1641_s15  ;;  %s2038_s15 = smov %s1747_s22 }
 0x54b   : > { %s2039_s16 = smov %s1736_s19  ;;  %22 = sbr.rel (!%p20_p9) target bundleno = 3 (0x3), region = 114 }
 0x550   :  { %1383 = vsyncpa [#allocation5], 1 }
 0x551   :  { %1385 = vsyncpa [#allocation5 + $0x1], 1 }

</bundles_post_ra>
